<compile_context>
chip_gen: v7x
topology: tpu7x:2x2x1
jax: 0.10.0
libtpu: 0.0.40
codegen_flags: <defaults>
</compile_context>

<pallas_src>
import functools

import jax
import jax.numpy as jnp
from jax.experimental import pallas as pl
from jax.experimental.pallas import tpu as pltpu


def _contract_keys(coef, V, *, unroll):
    """result[b, s, d] = sum_t coef[b, s, t] * V[b, t, d].

    For small S the contraction is unrolled into VPU broadcast-multiply-adds
    (avoids a serialized stream of <1%-occupancy per-batch MXU micro-matmuls);
    otherwise it falls back to a batched dot_general on the MXU.
    """
    if not unroll:
        return jnp.einsum("bst,btd->bsd", coef, V,
                          preferred_element_type=jnp.float32)
    S = V.shape[1]
    acc = coef[:, :, 0:1] * V[:, 0:1, :]
    for tt in range(1, S):
        acc = acc + coef[:, :, tt:tt + 1] * V[:, tt:tt + 1, :]
    return acc


def robust_attn_kernel(x_ref, wqkv_ref, bqkv_ref, o_ref, *,
                       S, D, L, epsilon, t, inv_scale, lane_pack, unroll_keys):
    rows, _ = x_ref.shape          # rows = TB * S
    TB = rows // S

    # --- Fused QKV projection: one (TB*S, D) @ (D, 3D) MXU matmul ------------
    # bf16 MXU operands, f32 accumulation; everything downstream stays f32.
    xb = x_ref[...].astype(jnp.bfloat16)
    w = wqkv_ref[...].astype(jnp.bfloat16)
    qkv = jnp.dot(xb, w, preferred_element_type=jnp.float32) + bqkv_ref[...]
    Q = qkv[:, 0:D].reshape(TB, S, D)
    K = qkv[:, D:2 * D].reshape(TB, S, D)
    V = qkv[:, 2 * D:3 * D].reshape(TB, S, D)

    # --- Scaled dot-product attention: softmax(Q K^T / sqrt(D), dim=-1) ------
    scores = jnp.einsum("bsd,btd->bst", Q, K,
                        preferred_element_type=jnp.float32) * inv_scale
    scores = scores - jnp.max(scores, axis=-1, keepdims=True)
    e = jnp.exp(scores)
    A = e / jnp.sum(e, axis=-1, keepdims=True)      # exact: rows sum to 1

    # --- RobustSum (norm='L2'): M = A @ V, then L reweighting iterations -----
    M = _contract_keys(A, V, unroll=unroll_keys)
    v_sq = jnp.sum(V * V, axis=-1)                  # (TB, S)
    for _ in range(L):
        m_sq = jnp.sum(M * M, axis=-1)              # (TB, S)
        mv = jnp.einsum("bsd,btd->bst", M, V,       # cdist cross term, no transpose
                        preferred_element_type=jnp.float32)
        d2 = m_sq[:, :, None] + v_sq[:, None, :] - 2.0 * mv
        dist = jnp.sqrt(jnp.maximum(d2, 0.0))
        # w = 1/(dist + eps) on the EUP; ww = w * A
        ww = A * pl.reciprocal(dist + epsilon, approx=True)
        denom = jnp.maximum(jnp.sum(jnp.abs(ww), axis=-1, keepdims=True), 1e-12)
        ww_norm = ww / denom                        # F.normalize(p=1, dim=-1), exact
        M_new = _contract_keys(ww_norm, V, unroll=unroll_keys)
        M = M_new if t == 1.0 else (1.0 - t) * M + t * M_new   # compile-time t check

    # --- pool=True: mean over the sequence axis -------------------------------
    pooled = jnp.mean(M, axis=1)                    # (TB, D)
    if lane_pack > 1:
        # Pack lane_pack batch rows along the lane axis (contiguous sublane
        # chunks concatenated along lanes) -> unmasked full-lane stores.
        r = TB // lane_pack
        packed = jnp.concatenate(
            [pooled[j * r:(j + 1) * r, :] for j in range(lane_pack)], axis=-1)
        o_ref[...] = packed                         # (TB // p, p * D)
    else:
        o_ref[...] = pooled


def _pick_batch_tile(B, cap=512):
    """Largest TB <= cap dividing B; multiple of 8 (block rule) unless TB == B.

    With B > cap this always leaves >= 2 grid steps, so the 'parallel' batch
    axis can be sharded across v7x's two TensorCores.
    """
    if B <= cap:
        return B
    for tb in range(cap, 7, -1):
        if B % tb == 0 and tb % 8 == 0:
            return tb
    return B   # no suitable divisor; whole batch in one grid step


def _pick_lane_pack(B, TB, D):
    """Pack p batch rows along lanes so the output block last dim is p*D
    (ideally 128): full-lane stores instead of masked (TB, D<128) stores."""
    if D >= 128 or 128 % D != 0:
        return 1
    p = 128 // D
    while p > 1:
        if TB % p == 0 and ((TB // p) % 8 == 0 or TB == B):
            return p
        p //= 2
    return 1


def robust_sum_self_attention(x, wq, bq, wk, bk, wv, bv, *,
                              L=3, epsilon=0.01, t=1.0,
                              batch_tile=None, unroll_keys=None):
    """x: (B, S, D) f32; wq/wk/wv: (D, D) (already transposed); b*: (1, D)."""
    B, S, D = x.shape
    TB = batch_tile if batch_tile is not None else _pick_batch_tile(B)
    assert B % TB == 0, (B, TB)
    assert TB % 8 == 0 or TB == B, "batch tile must be a multiple of 8 or the whole batch"
    if unroll_keys is None:
        unroll_keys = S <= 16
    lane_pack = _pick_lane_pack(B, TB, D)
    inv_scale = 1.0 / (float(D) ** 0.5)

    # Fuse the three projections into one (D, 3D) weight / (1, 3D) bias.
    wqkv = jnp.concatenate([wq, wk, wv], axis=1)
    bqkv = jnp.concatenate([bq, bk, bv], axis=1)

    # Collapse (B, S, D) -> (B*S, D) outside the kernel (free, contiguous) so each
    # grid step receives one sublane-dense (TB*S, D) slab for the fused projection.
    x2 = x.reshape(B * S, D)

    out_rows = B // lane_pack
    out_cols = lane_pack * D

    cost = pl.CostEstimate(
        flops=2 * B * (3 * S * D * D + (2 + 2 * L) * S * S * D),
        transcendentals=B * S * S * (1 + 2 * L),
        bytes_accessed=4 * (B * S * D + 3 * D * D + 3 * D + B * D),
    )

    # Rough per-step VMEM footprint; raise the scoped limit above v5e's 16 MiB
    # default while staying well under v7x's 64 MiB physical VMEM.
    est_vmem = 4 * TB * S * (10 * D + 4 * S) + 4 * (3 * D * D + 3 * D + 2 * TB * D)
    vmem_limit = int(min(max(2 * est_vmem, 32 * 1024 * 1024), 48 * 1024 * 1024))

    kernel = functools.partial(
        robust_attn_kernel, S=S, D=D, L=L, epsilon=epsilon, t=t,
        inv_scale=inv_scale, lane_pack=lane_pack, unroll_keys=unroll_keys)

    out = pl.pallas_call(
        kernel,
        out_shape=jax.ShapeDtypeStruct((out_rows, out_cols), jnp.float32),
        grid=(B // TB,),
        in_specs=[
            pl.BlockSpec((TB * S, D), lambda b: (b, 0)),     # x, one batch-tile slab
            pl.BlockSpec((D, 3 * D), lambda b: (0, 0)),      # fused Wqkv
            pl.BlockSpec((1, 3 * D), lambda b: (0, 0)),      # fused bias
        ],
        out_specs=pl.BlockSpec((TB // lane_pack, out_cols), lambda b: (b, 0)),
        compiler_params=pltpu.CompilerParams(
            dimension_semantics=("parallel",),
            vmem_limit_bytes=vmem_limit),
        cost_estimate=cost,
    )(x2, wqkv, bqkv)

    if lane_pack > 1:
        # Undo the in-kernel lane packing (cheap XLA-side reshape/transpose).
        g = B // TB
        r = TB // lane_pack
        out = out.reshape(g, r, lane_pack, D).transpose(0, 2, 1, 3).reshape(B, D)
    return out   # (B, D)


def _reference(x, wq, bq, wk, bk, wv, bv, *, L=3, epsilon=0.01, t=1.0):
    """Pure-JAX f32 reference mirroring the PyTorch forward (for sanity check)."""
    B, S, D = x.shape
    Q = x @ wq + bq
    K = x @ wk + bk
    V = x @ wv + bv
    scores = jnp.einsum("bsd,btd->bst", Q, K) / (float(D) ** 0.5)
    A = jax.nn.softmax(scores, axis=-1)
    M = jnp.einsum("bst,btd->bsd", A, V)
    v_sq = jnp.sum(V * V, axis=-1)
    for _ in range(L):
        m_sq = jnp.sum(M * M, axis=-1)
        d2 = (m_sq[:, :, None] + v_sq[:, None, :]
              - 2.0 * jnp.einsum("bsd,btd->bst", M, V))
        dist = jnp.sqrt(jnp.maximum(d2, 0.0))
        w = 1.0 / (dist + epsilon)
        ww = w * A
        ww_norm = ww / jnp.maximum(
            jnp.sum(jnp.abs(ww), axis=-1, keepdims=True), 1e-12)
        M = (1.0 - t) * M + t * jnp.einsum("bst,btd->bsd", ww_norm, V)
    return jnp.mean(M, axis=1)


if __name__ == "__main__":
    S, D = 8, 32
    key = jax.random.PRNGKey(0)
    kx, kwq, kbq, kwk, kbk, kwv, kbv, kx2 = jax.random.split(key, 8)

    # Deterministic parameter init mimicking nn.Linear's U(-1/sqrt(D), 1/sqrt(D)).
    bound = 1.0 / (D ** 0.5)
    wq = jax.random.uniform(kwq, (D, D), jnp.float32, -bound, bound)
    bq = jax.random.uniform(kbq, (1, D), jnp.float32, -bound, bound)
    wk = jax.random.uniform(kwk, (D, D), jnp.float32, -bound, bound)
    bk = jax.random.uniform(kbk, (1, D), jnp.float32, -bound, bound)
    wv = jax.random.uniform(kwv, (D, D), jnp.float32, -bound, bound)
    bv = jax.random.uniform(kbv, (1, D), jnp.float32, -bound, bound)

    # Case 1: module-sized tiny batch (single grid step, lane_pack=2).
    B1 = 2
    x1 = jax.random.normal(kx, (B1, S, D), dtype=jnp.float32)
    out1 = jax.block_until_ready(robust_sum_self_attention(x1, wq, bq, wk, bk, wv, bv))
    assert out1.shape == (B1, D), out1.shape
    ref1 = jax.block_until_ready(_reference(x1, wq, bq, wk, bk, wv, bv))
    assert jnp.allclose(out1, ref1, atol=1e-2, rtol=1e-2), (
        float(jnp.max(jnp.abs(out1 - ref1))))

    # Case 2: exercise the multi-step grid path (batch_tile=8, 2 grid steps).
    B2 = 16
    x2 = jax.random.normal(kx2, (B2, S, D), dtype=jnp.float32)
    out2 = jax.block_until_ready(
        robust_sum_self_attention(x2, wq, bq, wk, bk, wv, bv, batch_tile=8))
    assert out2.shape == (B2, D), out2.shape
    ref2 = jax.block_until_ready(_reference(x2, wq, bq, wk, bk, wv, bv))
    assert jnp.allclose(out2, ref2, atol=1e-2, rtol=1e-2), (
        float(jnp.max(jnp.abs(out2 - ref2))))

    print("KERNEL_OK")
</pallas_src>

<mosaic_0001>
module attributes {stable_mosaic.version = 11 : i64} {
  func.func @robust_attn_kernel(%arg0: i32, %arg1: memref<16x32xf32, #tpu.memory_space<vmem>>, %arg2: memref<32x96xf32, #tpu.memory_space<vmem>>, %arg3: memref<1x96xf32, #tpu.memory_space<vmem>>, %arg4: memref<1x64xf32, #tpu.memory_space<vmem>>) attributes {dimension_semantics = [#tpu.dimension_semantics<parallel>], iteration_bounds = array<i64: 1>, scalar_prefetch = 0 : i64, scratch_operands = 0 : i64, tpu.core_type = #tpu.core_type<tc>, window_params = [{transform_indices = @transform_0, window_bounds = array<i64: 16, 32>}, {pipeline_mode = #tpu.pipeline_mode<synchronous>, transform_indices = @transform_1, window_bounds = array<i64: 32, 96>}, {pipeline_mode = #tpu.pipeline_mode<synchronous>, transform_indices = @transform_2, window_bounds = array<i64: 1, 96>}, {transform_indices = @transform_3, window_bounds = array<i64: 1, 64>}]} {
    %c0 = arith.constant 0 : index
    %c0_0 = arith.constant 0 : index
    %0 = vector.load %arg1[%c0, %c0_0] : memref<16x32xf32, #tpu.memory_space<vmem>>, vector<16x32xf32>
    %1 = arith.truncf %0 : vector<16x32xf32> to vector<16x32xbf16>
    %c0_1 = arith.constant 0 : index
    %c0_2 = arith.constant 0 : index
    %2 = vector.load %arg2[%c0_1, %c0_2] : memref<32x96xf32, #tpu.memory_space<vmem>>, vector<32x96xf32>
    %3 = arith.truncf %2 : vector<32x96xf32> to vector<32x96xbf16>
    %cst = arith.constant dense<0.000000e+00> : vector<16x96xf32>
    %4 = tpu.matmul %1, %3, %cst {dimension_numbers = #tpu.dot_dimension_numbers<[1], [0], [0], [1], [0, 0, 1, 1], [], []>} : vector<16x32xbf16>, vector<32x96xbf16>, vector<16x96xf32> -> vector<16x96xf32>
    %c0_3 = arith.constant 0 : index
    %c0_4 = arith.constant 0 : index
    %5 = vector.load %arg3[%c0_3, %c0_4] : memref<1x96xf32, #tpu.memory_space<vmem>>, vector<1x96xf32>
    %6 = vector.broadcast %5 : vector<1x96xf32> to vector<16x96xf32>
    %7 = arith.addf %4, %6 : vector<16x96xf32>
    %8 = vector.extract_strided_slice %7 {offsets = [0, 0], sizes = [16, 32], strides = [1, 1]} : vector<16x96xf32> to vector<16x32xf32>
    %9 = vector.shape_cast %8 : vector<16x32xf32> to vector<2x8x32xf32>
    %10 = vector.extract_strided_slice %7 {offsets = [0, 32], sizes = [16, 32], strides = [1, 1]} : vector<16x96xf32> to vector<16x32xf32>
    %11 = vector.shape_cast %10 : vector<16x32xf32> to vector<2x8x32xf32>
    %12 = vector.extract_strided_slice %7 {offsets = [0, 64], sizes = [16, 32], strides = [1, 1]} : vector<16x96xf32> to vector<16x32xf32>
    %13 = vector.shape_cast %12 : vector<16x32xf32> to vector<2x8x32xf32>
    "tpu.trace_start"() <{level = 10 : i32, message = "bsd,btd->bst"}> : () -> ()
    %cst_5 = arith.constant dense<0.000000e+00> : vector<2x8x8xf32>
    %14 = tpu.matmul %9, %11, %cst_5 {dimension_numbers = #tpu.dot_dimension_numbers<[2], [2], [1], [1], [0, 0, 0, 1, 1, 1], [0], [0]>} : vector<2x8x32xf32>, vector<2x8x32xf32>, vector<2x8x8xf32> -> vector<2x8x8xf32>
    "tpu.trace_stop"() : () -> ()
    %cst_6 = arith.constant 0.176776692 : f32
    %15 = vector.broadcast %cst_6 : f32 to vector<2x8x8xf32>
    %16 = arith.mulf %14, %15 : vector<2x8x8xf32>
    %cst_7 = arith.constant dense<0xFF800000> : vector<2x8xf32>
    %17 = vector.multi_reduction <maximumf>, %16, %cst_7 [2] : vector<2x8x8xf32> to vector<2x8xf32>
    %18 = vector.shape_cast %17 : vector<2x8xf32> to vector<2x8x1xf32>
    %19 = vector.broadcast %18 : vector<2x8x1xf32> to vector<2x8x8xf32>
    %20 = arith.subf %16, %19 : vector<2x8x8xf32>
    %21 = math.exp %20 : vector<2x8x8xf32>
    %cst_8 = arith.constant dense<0.000000e+00> : vector<2x8xf32>
    %22 = vector.multi_reduction <add>, %21, %cst_8 [2] : vector<2x8x8xf32> to vector<2x8xf32>
    %23 = vector.shape_cast %22 : vector<2x8xf32> to vector<2x8x1xf32>
    %24 = vector.broadcast %23 : vector<2x8x1xf32> to vector<2x8x8xf32>
    %25 = arith.divf %21, %24 : vector<2x8x8xf32>
    %26 = vector.extract_strided_slice %25 {offsets = [0, 0, 0], sizes = [2, 8, 1], strides = [1, 1, 1]} : vector<2x8x8xf32> to vector<2x8x1xf32>
    %27 = vector.extract_strided_slice %13 {offsets = [0, 0, 0], sizes = [2, 1, 32], strides = [1, 1, 1]} : vector<2x8x32xf32> to vector<2x1x32xf32>
    %28 = vector.broadcast %26 : vector<2x8x1xf32> to vector<2x8x32xf32>
    %29 = vector.broadcast %27 : vector<2x1x32xf32> to vector<2x8x32xf32>
    %30 = arith.mulf %28, %29 : vector<2x8x32xf32>
    %31 = vector.extract_strided_slice %25 {offsets = [0, 0, 1], sizes = [2, 8, 1], strides = [1, 1, 1]} : vector<2x8x8xf32> to vector<2x8x1xf32>
    %32 = vector.extract_strided_slice %13 {offsets = [0, 1, 0], sizes = [2, 1, 32], strides = [1, 1, 1]} : vector<2x8x32xf32> to vector<2x1x32xf32>
    %33 = vector.broadcast %31 : vector<2x8x1xf32> to vector<2x8x32xf32>
    %34 = vector.broadcast %32 : vector<2x1x32xf32> to vector<2x8x32xf32>
    %35 = arith.mulf %33, %34 : vector<2x8x32xf32>
    %36 = arith.addf %30, %35 : vector<2x8x32xf32>
    %37 = vector.extract_strided_slice %25 {offsets = [0, 0, 2], sizes = [2, 8, 1], strides = [1, 1, 1]} : vector<2x8x8xf32> to vector<2x8x1xf32>
    %38 = vector.extract_strided_slice %13 {offsets = [0, 2, 0], sizes = [2, 1, 32], strides = [1, 1, 1]} : vector<2x8x32xf32> to vector<2x1x32xf32>
    %39 = vector.broadcast %37 : vector<2x8x1xf32> to vector<2x8x32xf32>
    %40 = vector.broadcast %38 : vector<2x1x32xf32> to vector<2x8x32xf32>
    %41 = arith.mulf %39, %40 : vector<2x8x32xf32>
    %42 = arith.addf %36, %41 : vector<2x8x32xf32>
    %43 = vector.extract_strided_slice %25 {offsets = [0, 0, 3], sizes = [2, 8, 1], strides = [1, 1, 1]} : vector<2x8x8xf32> to vector<2x8x1xf32>
    %44 = vector.extract_strided_slice %13 {offsets = [0, 3, 0], sizes = [2, 1, 32], strides = [1, 1, 1]} : vector<2x8x32xf32> to vector<2x1x32xf32>
    %45 = vector.broadcast %43 : vector<2x8x1xf32> to vector<2x8x32xf32>
    %46 = vector.broadcast %44 : vector<2x1x32xf32> to vector<2x8x32xf32>
    %47 = arith.mulf %45, %46 : vector<2x8x32xf32>
    %48 = arith.addf %42, %47 : vector<2x8x32xf32>
    %49 = vector.extract_strided_slice %25 {offsets = [0, 0, 4], sizes = [2, 8, 1], strides = [1, 1, 1]} : vector<2x8x8xf32> to vector<2x8x1xf32>
    %50 = vector.extract_strided_slice %13 {offsets = [0, 4, 0], sizes = [2, 1, 32], strides = [1, 1, 1]} : vector<2x8x32xf32> to vector<2x1x32xf32>
    %51 = vector.broadcast %49 : vector<2x8x1xf32> to vector<2x8x32xf32>
    %52 = vector.broadcast %50 : vector<2x1x32xf32> to vector<2x8x32xf32>
    %53 = arith.mulf %51, %52 : vector<2x8x32xf32>
    %54 = arith.addf %48, %53 : vector<2x8x32xf32>
    %55 = vector.extract_strided_slice %25 {offsets = [0, 0, 5], sizes = [2, 8, 1], strides = [1, 1, 1]} : vector<2x8x8xf32> to vector<2x8x1xf32>
    %56 = vector.extract_strided_slice %13 {offsets = [0, 5, 0], sizes = [2, 1, 32], strides = [1, 1, 1]} : vector<2x8x32xf32> to vector<2x1x32xf32>
    %57 = vector.broadcast %55 : vector<2x8x1xf32> to vector<2x8x32xf32>
    %58 = vector.broadcast %56 : vector<2x1x32xf32> to vector<2x8x32xf32>
    %59 = arith.mulf %57, %58 : vector<2x8x32xf32>
    %60 = arith.addf %54, %59 : vector<2x8x32xf32>
    %61 = vector.extract_strided_slice %25 {offsets = [0, 0, 6], sizes = [2, 8, 1], strides = [1, 1, 1]} : vector<2x8x8xf32> to vector<2x8x1xf32>
    %62 = vector.extract_strided_slice %13 {offsets = [0, 6, 0], sizes = [2, 1, 32], strides = [1, 1, 1]} : vector<2x8x32xf32> to vector<2x1x32xf32>
    %63 = vector.broadcast %61 : vector<2x8x1xf32> to vector<2x8x32xf32>
    %64 = vector.broadcast %62 : vector<2x1x32xf32> to vector<2x8x32xf32>
    %65 = arith.mulf %63, %64 : vector<2x8x32xf32>
    %66 = arith.addf %60, %65 : vector<2x8x32xf32>
    %67 = vector.extract_strided_slice %25 {offsets = [0, 0, 7], sizes = [2, 8, 1], strides = [1, 1, 1]} : vector<2x8x8xf32> to vector<2x8x1xf32>
    %68 = vector.extract_strided_slice %13 {offsets = [0, 7, 0], sizes = [2, 1, 32], strides = [1, 1, 1]} : vector<2x8x32xf32> to vector<2x1x32xf32>
    %69 = vector.broadcast %67 : vector<2x8x1xf32> to vector<2x8x32xf32>
    %70 = vector.broadcast %68 : vector<2x1x32xf32> to vector<2x8x32xf32>
    %71 = arith.mulf %69, %70 : vector<2x8x32xf32>
    %72 = arith.addf %66, %71 : vector<2x8x32xf32>
    %73 = arith.mulf %13, %13 : vector<2x8x32xf32>
    %cst_9 = arith.constant dense<0.000000e+00> : vector<2x8xf32>
    %74 = vector.multi_reduction <add>, %73, %cst_9 [2] : vector<2x8x32xf32> to vector<2x8xf32>
    %75 = arith.mulf %72, %72 : vector<2x8x32xf32>
    %cst_10 = arith.constant dense<0.000000e+00> : vector<2x8xf32>
    %76 = vector.multi_reduction <add>, %75, %cst_10 [2] : vector<2x8x32xf32> to vector<2x8xf32>
    "tpu.trace_start"() <{level = 10 : i32, message = "bsd,btd->bst"}> : () -> ()
    %cst_11 = arith.constant dense<0.000000e+00> : vector<2x8x8xf32>
    %77 = tpu.matmul %72, %13, %cst_11 {dimension_numbers = #tpu.dot_dimension_numbers<[2], [2], [1], [1], [0, 0, 0, 1, 1, 1], [0], [0]>} : vector<2x8x32xf32>, vector<2x8x32xf32>, vector<2x8x8xf32> -> vector<2x8x8xf32>
    "tpu.trace_stop"() : () -> ()
    %78 = vector.shape_cast %76 : vector<2x8xf32> to vector<2x8x1xf32>
    %79 = vector.shape_cast %74 : vector<2x8xf32> to vector<2x1x8xf32>
    %80 = vector.broadcast %78 : vector<2x8x1xf32> to vector<2x8x8xf32>
    %81 = vector.broadcast %79 : vector<2x1x8xf32> to vector<2x8x8xf32>
    %82 = arith.addf %80, %81 : vector<2x8x8xf32>
    %cst_12 = arith.constant 2.000000e+00 : f32
    %83 = vector.broadcast %cst_12 : f32 to vector<2x8x8xf32>
    %84 = arith.mulf %83, %77 : vector<2x8x8xf32>
    %85 = arith.subf %82, %84 : vector<2x8x8xf32>
    %cst_13 = arith.constant 0.000000e+00 : f32
    %86 = vector.broadcast %cst_13 : f32 to vector<2x8x8xf32>
    %87 = arith.maximumf %85, %86 : vector<2x8x8xf32>
    %88 = math.sqrt %87 : vector<2x8x8xf32>
    %cst_14 = arith.constant 0.00999999977 : f32
    %89 = vector.broadcast %cst_14 : f32 to vector<2x8x8xf32>
    %90 = arith.addf %88, %89 : vector<2x8x8xf32>
    %91 = tpu.reciprocal %90 {approx = true} : vector<2x8x8xf32> -> vector<2x8x8xf32>
    %92 = arith.mulf %25, %91 : vector<2x8x8xf32>
    %93 = math.absf %92 : vector<2x8x8xf32>
    %cst_15 = arith.constant dense<0.000000e+00> : vector<2x8xf32>
    %94 = vector.multi_reduction <add>, %93, %cst_15 [2] : vector<2x8x8xf32> to vector<2x8xf32>
    %95 = vector.shape_cast %94 : vector<2x8xf32> to vector<2x8x1xf32>
    %cst_16 = arith.constant 9.99999996E-13 : f32
    %96 = vector.broadcast %cst_16 : f32 to vector<2x8x1xf32>
    %97 = arith.maximumf %95, %96 : vector<2x8x1xf32>
    %98 = vector.broadcast %97 : vector<2x8x1xf32> to vector<2x8x8xf32>
    %99 = arith.divf %92, %98 : vector<2x8x8xf32>
    %100 = vector.extract_strided_slice %99 {offsets = [0, 0, 0], sizes = [2, 8, 1], strides = [1, 1, 1]} : vector<2x8x8xf32> to vector<2x8x1xf32>
    %101 = vector.extract_strided_slice %13 {offsets = [0, 0, 0], sizes = [2, 1, 32], strides = [1, 1, 1]} : vector<2x8x32xf32> to vector<2x1x32xf32>
    %102 = vector.broadcast %100 : vector<2x8x1xf32> to vector<2x8x32xf32>
    %103 = vector.broadcast %101 : vector<2x1x32xf32> to vector<2x8x32xf32>
    %104 = arith.mulf %102, %103 : vector<2x8x32xf32>
    %105 = vector.extract_strided_slice %99 {offsets = [0, 0, 1], sizes = [2, 8, 1], strides = [1, 1, 1]} : vector<2x8x8xf32> to vector<2x8x1xf32>
    %106 = vector.extract_strided_slice %13 {offsets = [0, 1, 0], sizes = [2, 1, 32], strides = [1, 1, 1]} : vector<2x8x32xf32> to vector<2x1x32xf32>
    %107 = vector.broadcast %105 : vector<2x8x1xf32> to vector<2x8x32xf32>
    %108 = vector.broadcast %106 : vector<2x1x32xf32> to vector<2x8x32xf32>
    %109 = arith.mulf %107, %108 : vector<2x8x32xf32>
    %110 = arith.addf %104, %109 : vector<2x8x32xf32>
    %111 = vector.extract_strided_slice %99 {offsets = [0, 0, 2], sizes = [2, 8, 1], strides = [1, 1, 1]} : vector<2x8x8xf32> to vector<2x8x1xf32>
    %112 = vector.extract_strided_slice %13 {offsets = [0, 2, 0], sizes = [2, 1, 32], strides = [1, 1, 1]} : vector<2x8x32xf32> to vector<2x1x32xf32>
    %113 = vector.broadcast %111 : vector<2x8x1xf32> to vector<2x8x32xf32>
    %114 = vector.broadcast %112 : vector<2x1x32xf32> to vector<2x8x32xf32>
    %115 = arith.mulf %113, %114 : vector<2x8x32xf32>
    %116 = arith.addf %110, %115 : vector<2x8x32xf32>
    %117 = vector.extract_strided_slice %99 {offsets = [0, 0, 3], sizes = [2, 8, 1], strides = [1, 1, 1]} : vector<2x8x8xf32> to vector<2x8x1xf32>
    %118 = vector.extract_strided_slice %13 {offsets = [0, 3, 0], sizes = [2, 1, 32], strides = [1, 1, 1]} : vector<2x8x32xf32> to vector<2x1x32xf32>
    %119 = vector.broadcast %117 : vector<2x8x1xf32> to vector<2x8x32xf32>
    %120 = vector.broadcast %118 : vector<2x1x32xf32> to vector<2x8x32xf32>
    %121 = arith.mulf %119, %120 : vector<2x8x32xf32>
    %122 = arith.addf %116, %121 : vector<2x8x32xf32>
    %123 = vector.extract_strided_slice %99 {offsets = [0, 0, 4], sizes = [2, 8, 1], strides = [1, 1, 1]} : vector<2x8x8xf32> to vector<2x8x1xf32>
    %124 = vector.extract_strided_slice %13 {offsets = [0, 4, 0], sizes = [2, 1, 32], strides = [1, 1, 1]} : vector<2x8x32xf32> to vector<2x1x32xf32>
    %125 = vector.broadcast %123 : vector<2x8x1xf32> to vector<2x8x32xf32>
    %126 = vector.broadcast %124 : vector<2x1x32xf32> to vector<2x8x32xf32>
    %127 = arith.mulf %125, %126 : vector<2x8x32xf32>
    %128 = arith.addf %122, %127 : vector<2x8x32xf32>
    %129 = vector.extract_strided_slice %99 {offsets = [0, 0, 5], sizes = [2, 8, 1], strides = [1, 1, 1]} : vector<2x8x8xf32> to vector<2x8x1xf32>
    %130 = vector.extract_strided_slice %13 {offsets = [0, 5, 0], sizes = [2, 1, 32], strides = [1, 1, 1]} : vector<2x8x32xf32> to vector<2x1x32xf32>
    %131 = vector.broadcast %129 : vector<2x8x1xf32> to vector<2x8x32xf32>
    %132 = vector.broadcast %130 : vector<2x1x32xf32> to vector<2x8x32xf32>
    %133 = arith.mulf %131, %132 : vector<2x8x32xf32>
    %134 = arith.addf %128, %133 : vector<2x8x32xf32>
    %135 = vector.extract_strided_slice %99 {offsets = [0, 0, 6], sizes = [2, 8, 1], strides = [1, 1, 1]} : vector<2x8x8xf32> to vector<2x8x1xf32>
    %136 = vector.extract_strided_slice %13 {offsets = [0, 6, 0], sizes = [2, 1, 32], strides = [1, 1, 1]} : vector<2x8x32xf32> to vector<2x1x32xf32>
    %137 = vector.broadcast %135 : vector<2x8x1xf32> to vector<2x8x32xf32>
    %138 = vector.broadcast %136 : vector<2x1x32xf32> to vector<2x8x32xf32>
    %139 = arith.mulf %137, %138 : vector<2x8x32xf32>
    %140 = arith.addf %134, %139 : vector<2x8x32xf32>
    %141 = vector.extract_strided_slice %99 {offsets = [0, 0, 7], sizes = [2, 8, 1], strides = [1, 1, 1]} : vector<2x8x8xf32> to vector<2x8x1xf32>
    %142 = vector.extract_strided_slice %13 {offsets = [0, 7, 0], sizes = [2, 1, 32], strides = [1, 1, 1]} : vector<2x8x32xf32> to vector<2x1x32xf32>
    %143 = vector.broadcast %141 : vector<2x8x1xf32> to vector<2x8x32xf32>
    %144 = vector.broadcast %142 : vector<2x1x32xf32> to vector<2x8x32xf32>
    %145 = arith.mulf %143, %144 : vector<2x8x32xf32>
    %146 = arith.addf %140, %145 : vector<2x8x32xf32>
    %147 = arith.mulf %146, %146 : vector<2x8x32xf32>
    %cst_17 = arith.constant dense<0.000000e+00> : vector<2x8xf32>
    %148 = vector.multi_reduction <add>, %147, %cst_17 [2] : vector<2x8x32xf32> to vector<2x8xf32>
    "tpu.trace_start"() <{level = 10 : i32, message = "bsd,btd->bst"}> : () -> ()
    %cst_18 = arith.constant dense<0.000000e+00> : vector<2x8x8xf32>
    %149 = tpu.matmul %146, %13, %cst_18 {dimension_numbers = #tpu.dot_dimension_numbers<[2], [2], [1], [1], [0, 0, 0, 1, 1, 1], [0], [0]>} : vector<2x8x32xf32>, vector<2x8x32xf32>, vector<2x8x8xf32> -> vector<2x8x8xf32>
    "tpu.trace_stop"() : () -> ()
    %150 = vector.shape_cast %148 : vector<2x8xf32> to vector<2x8x1xf32>
    %151 = vector.shape_cast %74 : vector<2x8xf32> to vector<2x1x8xf32>
    %152 = vector.broadcast %150 : vector<2x8x1xf32> to vector<2x8x8xf32>
    %153 = vector.broadcast %151 : vector<2x1x8xf32> to vector<2x8x8xf32>
    %154 = arith.addf %152, %153 : vector<2x8x8xf32>
    %cst_19 = arith.constant 2.000000e+00 : f32
    %155 = vector.broadcast %cst_19 : f32 to vector<2x8x8xf32>
    %156 = arith.mulf %155, %149 : vector<2x8x8xf32>
    %157 = arith.subf %154, %156 : vector<2x8x8xf32>
    %cst_20 = arith.constant 0.000000e+00 : f32
    %158 = vector.broadcast %cst_20 : f32 to vector<2x8x8xf32>
    %159 = arith.maximumf %157, %158 : vector<2x8x8xf32>
    %160 = math.sqrt %159 : vector<2x8x8xf32>
    %cst_21 = arith.constant 0.00999999977 : f32
    %161 = vector.broadcast %cst_21 : f32 to vector<2x8x8xf32>
    %162 = arith.addf %160, %161 : vector<2x8x8xf32>
    %163 = tpu.reciprocal %162 {approx = true} : vector<2x8x8xf32> -> vector<2x8x8xf32>
    %164 = arith.mulf %25, %163 : vector<2x8x8xf32>
    %165 = math.absf %164 : vector<2x8x8xf32>
    %cst_22 = arith.constant dense<0.000000e+00> : vector<2x8xf32>
    %166 = vector.multi_reduction <add>, %165, %cst_22 [2] : vector<2x8x8xf32> to vector<2x8xf32>
    %167 = vector.shape_cast %166 : vector<2x8xf32> to vector<2x8x1xf32>
    %cst_23 = arith.constant 9.99999996E-13 : f32
    %168 = vector.broadcast %cst_23 : f32 to vector<2x8x1xf32>
    %169 = arith.maximumf %167, %168 : vector<2x8x1xf32>
    %170 = vector.broadcast %169 : vector<2x8x1xf32> to vector<2x8x8xf32>
    %171 = arith.divf %164, %170 : vector<2x8x8xf32>
    %172 = vector.extract_strided_slice %171 {offsets = [0, 0, 0], sizes = [2, 8, 1], strides = [1, 1, 1]} : vector<2x8x8xf32> to vector<2x8x1xf32>
    %173 = vector.extract_strided_slice %13 {offsets = [0, 0, 0], sizes = [2, 1, 32], strides = [1, 1, 1]} : vector<2x8x32xf32> to vector<2x1x32xf32>
    %174 = vector.broadcast %172 : vector<2x8x1xf32> to vector<2x8x32xf32>
    %175 = vector.broadcast %173 : vector<2x1x32xf32> to vector<2x8x32xf32>
    %176 = arith.mulf %174, %175 : vector<2x8x32xf32>
    %177 = vector.extract_strided_slice %171 {offsets = [0, 0, 1], sizes = [2, 8, 1], strides = [1, 1, 1]} : vector<2x8x8xf32> to vector<2x8x1xf32>
    %178 = vector.extract_strided_slice %13 {offsets = [0, 1, 0], sizes = [2, 1, 32], strides = [1, 1, 1]} : vector<2x8x32xf32> to vector<2x1x32xf32>
    %179 = vector.broadcast %177 : vector<2x8x1xf32> to vector<2x8x32xf32>
    %180 = vector.broadcast %178 : vector<2x1x32xf32> to vector<2x8x32xf32>
    %181 = arith.mulf %179, %180 : vector<2x8x32xf32>
    %182 = arith.addf %176, %181 : vector<2x8x32xf32>
    %183 = vector.extract_strided_slice %171 {offsets = [0, 0, 2], sizes = [2, 8, 1], strides = [1, 1, 1]} : vector<2x8x8xf32> to vector<2x8x1xf32>
    %184 = vector.extract_strided_slice %13 {offsets = [0, 2, 0], sizes = [2, 1, 32], strides = [1, 1, 1]} : vector<2x8x32xf32> to vector<2x1x32xf32>
    %185 = vector.broadcast %183 : vector<2x8x1xf32> to vector<2x8x32xf32>
    %186 = vector.broadcast %184 : vector<2x1x32xf32> to vector<2x8x32xf32>
    %187 = arith.mulf %185, %186 : vector<2x8x32xf32>
    %188 = arith.addf %182, %187 : vector<2x8x32xf32>
    %189 = vector.extract_strided_slice %171 {offsets = [0, 0, 3], sizes = [2, 8, 1], strides = [1, 1, 1]} : vector<2x8x8xf32> to vector<2x8x1xf32>
    %190 = vector.extract_strided_slice %13 {offsets = [0, 3, 0], sizes = [2, 1, 32], strides = [1, 1, 1]} : vector<2x8x32xf32> to vector<2x1x32xf32>
    %191 = vector.broadcast %189 : vector<2x8x1xf32> to vector<2x8x32xf32>
    %192 = vector.broadcast %190 : vector<2x1x32xf32> to vector<2x8x32xf32>
    %193 = arith.mulf %191, %192 : vector<2x8x32xf32>
    %194 = arith.addf %188, %193 : vector<2x8x32xf32>
    %195 = vector.extract_strided_slice %171 {offsets = [0, 0, 4], sizes = [2, 8, 1], strides = [1, 1, 1]} : vector<2x8x8xf32> to vector<2x8x1xf32>
    %196 = vector.extract_strided_slice %13 {offsets = [0, 4, 0], sizes = [2, 1, 32], strides = [1, 1, 1]} : vector<2x8x32xf32> to vector<2x1x32xf32>
    %197 = vector.broadcast %195 : vector<2x8x1xf32> to vector<2x8x32xf32>
    %198 = vector.broadcast %196 : vector<2x1x32xf32> to vector<2x8x32xf32>
    %199 = arith.mulf %197, %198 : vector<2x8x32xf32>
    %200 = arith.addf %194, %199 : vector<2x8x32xf32>
    %201 = vector.extract_strided_slice %171 {offsets = [0, 0, 5], sizes = [2, 8, 1], strides = [1, 1, 1]} : vector<2x8x8xf32> to vector<2x8x1xf32>
    %202 = vector.extract_strided_slice %13 {offsets = [0, 5, 0], sizes = [2, 1, 32], strides = [1, 1, 1]} : vector<2x8x32xf32> to vector<2x1x32xf32>
    %203 = vector.broadcast %201 : vector<2x8x1xf32> to vector<2x8x32xf32>
    %204 = vector.broadcast %202 : vector<2x1x32xf32> to vector<2x8x32xf32>
    %205 = arith.mulf %203, %204 : vector<2x8x32xf32>
    %206 = arith.addf %200, %205 : vector<2x8x32xf32>
    %207 = vector.extract_strided_slice %171 {offsets = [0, 0, 6], sizes = [2, 8, 1], strides = [1, 1, 1]} : vector<2x8x8xf32> to vector<2x8x1xf32>
    %208 = vector.extract_strided_slice %13 {offsets = [0, 6, 0], sizes = [2, 1, 32], strides = [1, 1, 1]} : vector<2x8x32xf32> to vector<2x1x32xf32>
    %209 = vector.broadcast %207 : vector<2x8x1xf32> to vector<2x8x32xf32>
    %210 = vector.broadcast %208 : vector<2x1x32xf32> to vector<2x8x32xf32>
    %211 = arith.mulf %209, %210 : vector<2x8x32xf32>
    %212 = arith.addf %206, %211 : vector<2x8x32xf32>
    %213 = vector.extract_strided_slice %171 {offsets = [0, 0, 7], sizes = [2, 8, 1], strides = [1, 1, 1]} : vector<2x8x8xf32> to vector<2x8x1xf32>
    %214 = vector.extract_strided_slice %13 {offsets = [0, 7, 0], sizes = [2, 1, 32], strides = [1, 1, 1]} : vector<2x8x32xf32> to vector<2x1x32xf32>
    %215 = vector.broadcast %213 : vector<2x8x1xf32> to vector<2x8x32xf32>
    %216 = vector.broadcast %214 : vector<2x1x32xf32> to vector<2x8x32xf32>
    %217 = arith.mulf %215, %216 : vector<2x8x32xf32>
    %218 = arith.addf %212, %217 : vector<2x8x32xf32>
    %219 = arith.mulf %218, %218 : vector<2x8x32xf32>
    %cst_24 = arith.constant dense<0.000000e+00> : vector<2x8xf32>
    %220 = vector.multi_reduction <add>, %219, %cst_24 [2] : vector<2x8x32xf32> to vector<2x8xf32>
    "tpu.trace_start"() <{level = 10 : i32, message = "bsd,btd->bst"}> : () -> ()
    %cst_25 = arith.constant dense<0.000000e+00> : vector<2x8x8xf32>
    %221 = tpu.matmul %218, %13, %cst_25 {dimension_numbers = #tpu.dot_dimension_numbers<[2], [2], [1], [1], [0, 0, 0, 1, 1, 1], [0], [0]>} : vector<2x8x32xf32>, vector<2x8x32xf32>, vector<2x8x8xf32> -> vector<2x8x8xf32>
    "tpu.trace_stop"() : () -> ()
    %222 = vector.shape_cast %220 : vector<2x8xf32> to vector<2x8x1xf32>
    %223 = vector.shape_cast %74 : vector<2x8xf32> to vector<2x1x8xf32>
    %224 = vector.broadcast %222 : vector<2x8x1xf32> to vector<2x8x8xf32>
    %225 = vector.broadcast %223 : vector<2x1x8xf32> to vector<2x8x8xf32>
    %226 = arith.addf %224, %225 : vector<2x8x8xf32>
    %cst_26 = arith.constant 2.000000e+00 : f32
    %227 = vector.broadcast %cst_26 : f32 to vector<2x8x8xf32>
    %228 = arith.mulf %227, %221 : vector<2x8x8xf32>
    %229 = arith.subf %226, %228 : vector<2x8x8xf32>
    %cst_27 = arith.constant 0.000000e+00 : f32
    %230 = vector.broadcast %cst_27 : f32 to vector<2x8x8xf32>
    %231 = arith.maximumf %229, %230 : vector<2x8x8xf32>
    %232 = math.sqrt %231 : vector<2x8x8xf32>
    %cst_28 = arith.constant 0.00999999977 : f32
    %233 = vector.broadcast %cst_28 : f32 to vector<2x8x8xf32>
    %234 = arith.addf %232, %233 : vector<2x8x8xf32>
    %235 = tpu.reciprocal %234 {approx = true} : vector<2x8x8xf32> -> vector<2x8x8xf32>
    %236 = arith.mulf %25, %235 : vector<2x8x8xf32>
    %237 = math.absf %236 : vector<2x8x8xf32>
    %cst_29 = arith.constant dense<0.000000e+00> : vector<2x8xf32>
    %238 = vector.multi_reduction <add>, %237, %cst_29 [2] : vector<2x8x8xf32> to vector<2x8xf32>
    %239 = vector.shape_cast %238 : vector<2x8xf32> to vector<2x8x1xf32>
    %cst_30 = arith.constant 9.99999996E-13 : f32
    %240 = vector.broadcast %cst_30 : f32 to vector<2x8x1xf32>
    %241 = arith.maximumf %239, %240 : vector<2x8x1xf32>
    %242 = vector.broadcast %241 : vector<2x8x1xf32> to vector<2x8x8xf32>
    %243 = arith.divf %236, %242 : vector<2x8x8xf32>
    %244 = vector.extract_strided_slice %243 {offsets = [0, 0, 0], sizes = [2, 8, 1], strides = [1, 1, 1]} : vector<2x8x8xf32> to vector<2x8x1xf32>
    %245 = vector.extract_strided_slice %13 {offsets = [0, 0, 0], sizes = [2, 1, 32], strides = [1, 1, 1]} : vector<2x8x32xf32> to vector<2x1x32xf32>
    %246 = vector.broadcast %244 : vector<2x8x1xf32> to vector<2x8x32xf32>
    %247 = vector.broadcast %245 : vector<2x1x32xf32> to vector<2x8x32xf32>
    %248 = arith.mulf %246, %247 : vector<2x8x32xf32>
    %249 = vector.extract_strided_slice %243 {offsets = [0, 0, 1], sizes = [2, 8, 1], strides = [1, 1, 1]} : vector<2x8x8xf32> to vector<2x8x1xf32>
    %250 = vector.extract_strided_slice %13 {offsets = [0, 1, 0], sizes = [2, 1, 32], strides = [1, 1, 1]} : vector<2x8x32xf32> to vector<2x1x32xf32>
    %251 = vector.broadcast %249 : vector<2x8x1xf32> to vector<2x8x32xf32>
    %252 = vector.broadcast %250 : vector<2x1x32xf32> to vector<2x8x32xf32>
    %253 = arith.mulf %251, %252 : vector<2x8x32xf32>
    %254 = arith.addf %248, %253 : vector<2x8x32xf32>
    %255 = vector.extract_strided_slice %243 {offsets = [0, 0, 2], sizes = [2, 8, 1], strides = [1, 1, 1]} : vector<2x8x8xf32> to vector<2x8x1xf32>
    %256 = vector.extract_strided_slice %13 {offsets = [0, 2, 0], sizes = [2, 1, 32], strides = [1, 1, 1]} : vector<2x8x32xf32> to vector<2x1x32xf32>
    %257 = vector.broadcast %255 : vector<2x8x1xf32> to vector<2x8x32xf32>
    %258 = vector.broadcast %256 : vector<2x1x32xf32> to vector<2x8x32xf32>
    %259 = arith.mulf %257, %258 : vector<2x8x32xf32>
    %260 = arith.addf %254, %259 : vector<2x8x32xf32>
    %261 = vector.extract_strided_slice %243 {offsets = [0, 0, 3], sizes = [2, 8, 1], strides = [1, 1, 1]} : vector<2x8x8xf32> to vector<2x8x1xf32>
    %262 = vector.extract_strided_slice %13 {offsets = [0, 3, 0], sizes = [2, 1, 32], strides = [1, 1, 1]} : vector<2x8x32xf32> to vector<2x1x32xf32>
    %263 = vector.broadcast %261 : vector<2x8x1xf32> to vector<2x8x32xf32>
    %264 = vector.broadcast %262 : vector<2x1x32xf32> to vector<2x8x32xf32>
    %265 = arith.mulf %263, %264 : vector<2x8x32xf32>
    %266 = arith.addf %260, %265 : vector<2x8x32xf32>
    %267 = vector.extract_strided_slice %243 {offsets = [0, 0, 4], sizes = [2, 8, 1], strides = [1, 1, 1]} : vector<2x8x8xf32> to vector<2x8x1xf32>
    %268 = vector.extract_strided_slice %13 {offsets = [0, 4, 0], sizes = [2, 1, 32], strides = [1, 1, 1]} : vector<2x8x32xf32> to vector<2x1x32xf32>
    %269 = vector.broadcast %267 : vector<2x8x1xf32> to vector<2x8x32xf32>
    %270 = vector.broadcast %268 : vector<2x1x32xf32> to vector<2x8x32xf32>
    %271 = arith.mulf %269, %270 : vector<2x8x32xf32>
    %272 = arith.addf %266, %271 : vector<2x8x32xf32>
    %273 = vector.extract_strided_slice %243 {offsets = [0, 0, 5], sizes = [2, 8, 1], strides = [1, 1, 1]} : vector<2x8x8xf32> to vector<2x8x1xf32>
    %274 = vector.extract_strided_slice %13 {offsets = [0, 5, 0], sizes = [2, 1, 32], strides = [1, 1, 1]} : vector<2x8x32xf32> to vector<2x1x32xf32>
    %275 = vector.broadcast %273 : vector<2x8x1xf32> to vector<2x8x32xf32>
    %276 = vector.broadcast %274 : vector<2x1x32xf32> to vector<2x8x32xf32>
    %277 = arith.mulf %275, %276 : vector<2x8x32xf32>
    %278 = arith.addf %272, %277 : vector<2x8x32xf32>
    %279 = vector.extract_strided_slice %243 {offsets = [0, 0, 6], sizes = [2, 8, 1], strides = [1, 1, 1]} : vector<2x8x8xf32> to vector<2x8x1xf32>
    %280 = vector.extract_strided_slice %13 {offsets = [0, 6, 0], sizes = [2, 1, 32], strides = [1, 1, 1]} : vector<2x8x32xf32> to vector<2x1x32xf32>
    %281 = vector.broadcast %279 : vector<2x8x1xf32> to vector<2x8x32xf32>
    %282 = vector.broadcast %280 : vector<2x1x32xf32> to vector<2x8x32xf32>
    %283 = arith.mulf %281, %282 : vector<2x8x32xf32>
    %284 = arith.addf %278, %283 : vector<2x8x32xf32>
    %285 = vector.extract_strided_slice %243 {offsets = [0, 0, 7], sizes = [2, 8, 1], strides = [1, 1, 1]} : vector<2x8x8xf32> to vector<2x8x1xf32>
    %286 = vector.extract_strided_slice %13 {offsets = [0, 7, 0], sizes = [2, 1, 32], strides = [1, 1, 1]} : vector<2x8x32xf32> to vector<2x1x32xf32>
    %287 = vector.broadcast %285 : vector<2x8x1xf32> to vector<2x8x32xf32>
    %288 = vector.broadcast %286 : vector<2x1x32xf32> to vector<2x8x32xf32>
    %289 = arith.mulf %287, %288 : vector<2x8x32xf32>
    %290 = arith.addf %284, %289 : vector<2x8x32xf32>
    %cst_31 = arith.constant dense<0.000000e+00> : vector<2x32xf32>
    %291 = vector.multi_reduction <add>, %290, %cst_31 [1] : vector<2x8x32xf32> to vector<2x32xf32>
    %cst_32 = arith.constant 8.000000e+00 : f32
    %292 = vector.broadcast %cst_32 : f32 to vector<2x32xf32>
    %293 = arith.divf %291, %292 : vector<2x32xf32>
    %294 = vector.extract_strided_slice %293 {offsets = [0, 0], sizes = [1, 32], strides = [1, 1]} : vector<2x32xf32> to vector<1x32xf32>
    %295 = vector.extract_strided_slice %293 {offsets = [1, 0], sizes = [1, 32], strides = [1, 1]} : vector<2x32xf32> to vector<1x32xf32>
    %296 = tpu.concatenate %294, %295 in 1 : vector<1x32xf32>, vector<1x32xf32> -> vector<1x64xf32>
    %c0_33 = arith.constant 0 : index
    %c0_34 = arith.constant 0 : index
    %297 = vector.load %arg4[%c0_33, %c0_34] : memref<1x64xf32, #tpu.memory_space<vmem>>, vector<1x64xf32>
    tpu.vector_store %arg4[%c0_33, %c0_34], %296 {strides = array<i32>} : memref<1x64xf32, #tpu.memory_space<vmem>>, vector<1x64xf32>,
    return
  }
  func.func @transform_0(%arg0: i32) -> (i32, i32) {
    %c0_i32 = arith.constant 0 : i32
    %c0_i32_0 = arith.constant 0 : i32
    return %arg0, %c0_i32 : i32, i32
  }
  func.func @transform_1(%arg0: i32) -> (i32, i32) {
    %c0_i32 = arith.constant 0 : i32
    %c0_i32_0 = arith.constant 0 : i32
    %c0_i32_1 = arith.constant 0 : i32
    return %c0_i32, %c0_i32_0 : i32, i32
  }
  func.func @transform_2(%arg0: i32) -> (i32, i32) {
    %c0_i32 = arith.constant 0 : i32
    %c0_i32_0 = arith.constant 0 : i32
    %c0_i32_1 = arith.constant 0 : i32
    return %c0_i32, %c0_i32_0 : i32, i32
  }
  func.func @transform_3(%arg0: i32) -> (i32, i32) {
    %c0_i32 = arith.constant 0 : i32
    %c0_i32_0 = arith.constant 0 : i32
    return %arg0, %c0_i32 : i32, i32
  }
}

</mosaic_0001>

<bundles_post_ra>
// kernel: tpu_custom_call.1
= control target key start
LH: loop header
LB: loop body
LE: loop exit
PB: predicated region body
PF: predicated region fallthrough
CT: control target
= control target key end

     0   :  { %8 = vsyncpa [#allocation3], 0  ;;  %s2144_s0 = inlined_call_operand.hbm [shape: f32[16,32], index: 0, kind: input, shape index: {}]   ;;  %s2145_s1 = inlined_call_operand.hbm [shape: f32[32,96], index: 1, kind: input, shape index: {}]   ;;  %s2146_s2 = inlined_call_operand.vmem [shape: f32[1,96], index: 2, kind: input, shape index: {}]   ;;  %s2147_s3 = inlined_call_operand.hbm [shape: f32[1,64], index: 3, kind: output, shape index: {}]  }
   0x1   :  { %9 = vsyncpa [#allocation6], 0 }
   0x2   :  { %10 = vsyncpa [#allocation4], 0  ;;  %s1737_s12 = smov [#allocation2]   ;;  %s1665_s16 = scalar_lea.hbm %s2144_s0, 256 }
   0x3   :  { %s16_s13 = sshll.u32 %s1737_s12, 4  ;;  %p1666_p0 = scmp.ne.s32.totalorder %s2144_s0, %s1665_s16  ;;  %s17_s13 = int_to_ptr.vmem [resolvable:$true] %s16_s13 }
   0x4   :  { %p1669_p1 = scmp.lt.u32.totalorder %s1665_s16, %s2144_s0 }
   0x6   :  { %p1671_p2 = pnand %p1669_p1, %p1666_p0 }
   0x8   :  { %1674 = shalt.err (!%p1671_p2)
}
   0x9   :  { %s1675_s21 = scalar_lea.vmem %s17_s13, 256  ;;  %p1680_p4 = scmp.lt.s32.totalorder %s17_s13, %s17_s13 }
   0xa   :  { %p1676_p3 = scmp.ne.s32.totalorder %s17_s13, %s1675_s21  ;;  %p1681_p5 = scmp.lt.s32.totalorder %s1675_s21, %s1675_s21 }
   0xc   :  { %p1682_p6 = por %p1681_p5, %p1680_p4 }
   0xe   :  { %p1683_p7 = pnand %p1682_p6, %p1676_p3 }
  0x10   :  { %1686 = shalt.err (!%p1683_p7)
}
  0x11   :  { %s1738_s22 = smov 128   ;;  %s1739_s23 = smov 8  }
  0x12   :  { %22 = dma.hbm_to_vmem [thread:$0]  %s2144_s0, 256, %s17_s13, [#allocation3], %s1738_s22, %s1738_s22, %s1739_s23  }
  0x13   :  { %s1740_s26 = smov [#allocation5]   ;;  %s1687_s30 = scalar_lea.hbm %s2145_s1, 512 }
  0x14   :  { %s28_s27 = sshll.u32 %s1740_s26, 4  ;;  %p1688_p8 = scmp.ne.s32.totalorder %s2145_s1, %s1687_s30  ;;  %s29_s27 = int_to_ptr.vmem [resolvable:$true] %s28_s27 }
  0x15   :  { %p1691_p9 = scmp.lt.u32.totalorder %s1687_s30, %s2145_s1 }
  0x17   :  { %p1693_p10 = pnand %p1691_p9, %p1688_p8 }
  0x19   :  { %1696 = shalt.err (!%p1693_p10)
}
  0x1a   :  { %s1697_s8 = scalar_lea.vmem %s29_s27, 512  ;;  %p1702_p12 = scmp.lt.s32.totalorder %s29_s27, %s29_s27 }
  0x1b   :  { %p1698_p11 = scmp.ne.s32.totalorder %s29_s27, %s1697_s8  ;;  %p1703_p13 = scmp.lt.s32.totalorder %s1697_s8, %s1697_s8 }
  0x1d   :  { %p1704_p0 = por %p1703_p13, %p1702_p12 }
  0x1f   :  { %p1705_p1 = pnand %p1704_p0, %p1698_p11 }
  0x21   :  { %1708 = shalt.err (!%p1705_p1)
}
  0x22   :  { %34 = dma.hbm_to_vmem [thread:$0]  %s2145_s1, 512, %s29_s27, [#allocation6], %s1738_s22, %s1738_s22, %s1739_s23  }
  0x23   :  { %1731 = dma.done.wait [#allocation3], 256  }
  0x24   :  { %1732 = vsyncadd [#allocation3], 4294967040 }
  0x25   :  { %1733 = dma.done.wait [#allocation6], 512  }
  0x26   :  { %1734 = vsyncadd [#allocation6], 4294966784  ;;  %v1741_v0 = vmov 0.0   ;;  %vm1742_vm0 = vmmov 0   ;;  %v47_v1 = vld [vmem:[#allocation5] sm:$0xff]  ;;  %v48_v2 = vld [vmem:[#allocation5 + $0x8] sm:$0xff]  ;;  %v294_v51 = vlaneseq }
  0x27   :  { %1494 = vmatprep.subr.bf16.mxu0 %v1741_v0  ;;  %1498 = vmatprep.mubr.msk.bf16.mxu0 %vm1742_vm0, %v1741_v0  ;;  %v49_v3 = vld [vmem:[#allocation5 + $0x10] sm:$0xff]  ;;  %v51_v4 = vpack.c.bf16 %v48_v2, %v47_v1  ;;  %v50_v5 = vld [vmem:[#allocation5 + $0x18] sm:$0xff]  ;;  %vm60_vm1 = vcmask 261120   ;;  %s1743_s11 = smov 96   ;;  %vm261_vm2 = vcmask 64512   ;;  %v1744_v37 = vmov 2  }
  0x28   :  { %1502 = vmatprep.subr.mxu1 %v1741_v0  ;;  %1504 = vmatprep.mubr.msk.f32.mxu1 %vm1742_vm0, %v1741_v0  ;;  %v52_v6 = vpack.c.bf16 %v50_v5, %v49_v3  ;;  %v44_v7 = vld [vmem:[#allocation2] sm:$0xff]  ;;  %v45_v8 = vld [vmem:[#allocation2 + $0x8] sm:$0xff]  ;;  %v1745_v38 = vmov 0   ;;  %v1747_v42 = vmov 1   ;;  %v1748_v43 = vmov 6   ;;  %s1753_s12 = smov [#allocation7]  }
  0x29   :  { %1495 = vmatpush3.bf16.msra.mxu0 %v51_v4  ;;  %v46_v9 = vpack.c.bf16 %v45_v8, %v44_v7  ;;  %v1457_v10 = vld [vmem:[%s2146_s2] ss:$0 sm:$0xff]  ;;  %1561 = vset.pattern.permute.xlu0 %v1744_v37  ;;  %s1746_s2 = smov 64   ;;  %v1749_v44 = vmov 3   ;;  %v1750_v45 = vmov 4   ;;  %v1751_v47 = vmov 5  }
  0x2a   :  { %1496 = vmatprep.subr.bf16.mxu0 %v1741_v0  ;;  %1559 = vset.pattern.permute.xlu1 %v1745_v38  ;;  %v1752_v48 = vmov 7   ;;  %v1879_v54 = vshrl.u32 %v294_v51, 7  ;;  %vm1412_vm15 = vcmask 785920   ;;  %s1447_s13 = sshll.u32 %s1753_s12, 4  ;;  %s1448_s13 = int_to_ptr.vmem [resolvable:$true] %s1447_s13 }
  0x2b   :  { %s1709_s14 = scalar_lea.vmem %s1448_s13, 16  ;;  %s1713_s15 = scalar_lea.vmem %s1448_s13, 32 }
  0x2c   :  { %v314_v57 = vsub.s32 1, %v1879_v54  ;;  %v296_v58 = vsub.s32 0, %v1879_v54  ;;  %v334_v61 = vsub.s32 2, %v1879_v54  ;;  %v354_v2 = vsub.s32 3, %v1879_v54  ;;  %p1710_p2 = scmp.ne.s32.totalorder %s1448_s13, %s1709_s14  ;;  %p1714_p3 = scmp.lt.s32.totalorder %s1448_s13, %s1448_s13 }
  0x2d   :  { %1497 = vmatpush3.bf16.msra.mxu0 %v52_v6  ;;  %v374_v6 = vsub.s32 4, %v1879_v54  ;;  %p1715_p4 = scmp.lt.s32.totalorder %s1713_s15, %s1709_s14 }
  0x2e   :  { %1517 = vmatprep.subr.mxu0 %v1741_v0 }
  0x2f   :  { %p1716_p5 = por %p1715_p4, %p1714_p3 }
  0x30   :  { %1499 = vmatmul.mubr.msk.bf16.vlgmr.msra.gmra.mrb[0].mxu0 %vm60_vm1, %v46_v9  ;;  %v394_v9 = vsub.s32 5, %v1879_v54 }
  0x31   :  { %1519 = vmatprep.mubr.msk.f32.mxu0 %vm1742_vm0, %v1741_v0  ;;  %p1717_p6 = pnand %p1716_p5, %p1710_p2 }
 0x103   :  { %v98_v11 = vpop.f32.mrb[0].mxu0 }
 0x104   :  { %v1812_v12 = vadd.f32 %v1457_v10, %v98_v11  ;;  %v1500_v13 = vpop.f32.mrb[1].mxu0 }
 0x105   :  { %v101_v14 = vpop.f32.mrb[2].mxu0 }
 0x106   :  { %106 = vrot.lane.b32.xlu0 %v1812_v12, %s1743_s11  ;;  %v1501_v15 = vpop.f32.mrb[3].mxu0  ;;  %v1816_v16 = vadd.f32 %v1457_v10, %v101_v14  ;;  %v1889_v60 = vrot.slane %v1812_v12, %v314_v57  ;;  %v1893_v62 = vrot.slane %v1812_v12, %v296_v58  ;;  %v1899_v4 = vrot.slane %v1812_v12, %v334_v61 }
 0x107   :  { %v1904_v8 = vrot.slane %v1812_v12, %v354_v2  ;;  %v1909_v14 = vrot.slane %v1812_v12, %v374_v6  ;;  %v414_v15 = vsub.s32 6, %v1879_v54 }
 0x10a   :  { %183 = vrot.lane.b32.xlu0 %v1816_v16, %s1743_s11 }
 0x178   :  { %v107_v17 = vpop.permute.xlu0 %106 }
 0x179   :  { %1503 = vmatpush3.xpose.msk.msra.mxu1 %vm60_vm1, %v107_v17 }
 0x17a   :  { %1507 = vmatprep.subr.mxu1 %v1741_v0 }
 0x17c   :  { %1505 = vmatmul.mubr.msk.f32.vlgmr.msra.gmra.mrb[0].mxu1 %vm60_vm1, %v1812_v12  ;;  %v184_v18 = vpop.permute.xlu0 %183 }
 0x17d   :  { %1508 = vmatpush3.xpose.msk.msra.mxu1 %vm60_vm1, %v184_v18  ;;  %1509 = vmatprep.mubr.msk.f32.mxu1 %vm1742_vm0, %v1741_v0  ;;  %v1914_v18 = vrot.slane %v1812_v12, %v394_v9 }
 0x17e   :  { %1512 = vmatprep.subr.mxu1 %v1741_v0 }
 0x180   :  { %1510 = vmatmul.mubr.msk.f32.vlgmr.msra.gmra.mrb[2].mxu1 %vm60_vm1, %v1816_v16 }
 0x181   :  { %1514 = vmatprep.mubr.msk.f32.mxu1 %vm1742_vm0, %v1741_v0 }
 0x24f   :  { %v178_v19 = vpop.f32.mrb[0].mxu1 }
 0x250   :  { %v259_v20 = vmul.f32 0.17677669, %v178_v19  ;;  %v1506_v21 = vpop.f32.mrb[1].mxu1 }
 0x251   :  { %v1918_v21 = vrot.slane %v1812_v12, %v414_v15 }
 0x252   :  { %v262_v22 = vsel %vm261_vm2, %v259_v20, -inf }
 0x253   :  { %263 = vmax.xlane.f32.xlu1 %v262_v22  ;;  %v255_v23 = vpop.f32.mrb[2].mxu1 }
 0x254   :  { %v260_v24 = vmul.f32 0.17677669, %v255_v23  ;;  %v1511_v25 = vpop.f32.mrb[3].mxu1  ;;  %v434_v23 = vsub.s32 7, %v1879_v54 }
 0x256   :  { %v265_v26 = vsel %vm261_vm2, %v260_v24, -inf }
 0x257   :  { %266 = vmax.xlane.f32.xlu1 %v265_v26 }
 0x2e0   :  { %v264_v27 = vpop.xlane.xlu1 %263 }
 0x2e1   :  { %v268_v28 = vsub.f32 %v259_v20, %v264_v27  ;;  %v1923_v27 = vrot.slane %v1812_v12, %v434_v23 }
 0x2e3   :  { %v270_v29 = vmul.f32 1.442695, %v268_v28 }
 0x2e4   :  { %v267_v30 = vpop.xlane.xlu1 %266 }
 0x2e5   :  { %1621 = vpow2.f32 %v270_v29  ;;  %v269_v31 = vsub.f32 %v260_v24, %v267_v30 }
 0x2e7   :  { %v272_v32 = vmul.f32 1.442695, %v269_v31 }
 0x2e9   :  { %1623 = vpow2.f32 %v272_v32 }
 0x2ef   :  { %v1622_v33 = vpop.eup %1621 }
 0x2f0   :  { %v274_v34 = vsel %vm261_vm2, %v1622_v33, 0.0 }
 0x2f1   :  { %275 = vadd.xlane.f32.xlu0 %v274_v34 }
 0x2f3   :  { %v1624_v35 = vpop.eup %1623 }
 0x2f4   :  { %v277_v36 = vsel %vm261_vm2, %v1624_v35, 0.0 }
 0x2f5   :  { %278 = vadd.xlane.f32.xlu1 %v277_v36 }
 0x37e   :  { %v276_v39 = vpop.xlane.xlu0 %275 }
 0x37f   :  { %1625 = vrcp.f32 %v276_v39 }
 0x382   :  { %v279_v46 = vpop.xlane.xlu1 %278 }
 0x383   :  { %1627 = vrcp.f32 %v279_v46 }
 0x389   :  { %v1626_v40 = vpop.eup %1625 }
 0x38a   :  { %v1838_v41 = vmul.f32 %v1626_v40, %v1622_v33  ;;  %v444_v33 = vmul.f32 %v1812_v12, %v1812_v12  ;;  %v1932_v40 = vrot.slane %v1816_v16, %v314_v57 }
 0x38c   :  { %325 = vperm.xlu0 %1561, %v1838_v41   ;;  %286 = vperm.xlu1 %1559, %v1838_v41  }
 0x38d   :  { %v1628_v49 = vpop.eup %1627 }
 0x38e   :  { %v1857_v50 = vmul.f32 %v1628_v49, %v1624_v35  ;;  %v1935_v49 = vrot.slane %v1816_v16, %v296_v58 }
 0x390   :  { %479 = vrot.lane.b32.xlu0 %v1812_v12, %s1746_s2  ;;  %1560 = vset.pattern.permute.xlu1 %v1747_v42 }
 0x391   :  { %305 = vperm.xlu1 %1560, %v1838_v41   ;;  %1581 = vset.pattern.permute.xlu0 %v1748_v43 }
 0x395   :  { %1562 = vset.pattern.permute.xlu1 %v1749_v44 }
 0x396   :  { %345 = vperm.xlu1 %1562, %v1838_v41  }
 0x39a   :  { %1563 = vset.pattern.permute.xlu1 %v1750_v45 }
 0x39b   :  { %365 = vperm.xlu1 %1563, %v1838_v41  }
 0x39f   :  { %1564 = vset.pattern.permute.xlu1 %v1751_v47 }
 0x3a0   :  { %385 = vperm.xlu1 %1564, %v1838_v41  }
 0x3a4   :  { %1565 = vset.pattern.permute.xlu1 %v1748_v43 }
 0x3a5   :  { %405 = vperm.xlu1 %1565, %v1838_v41  }
 0x3a9   :  { %1566 = vset.pattern.permute.xlu1 %v1752_v48 }
 0x3aa   :  { %425 = vperm.xlu1 %1566, %v1838_v41  }
 0x3ae   :  { %1567 = vset.pattern.permute.xlu1 %v1745_v38 }
 0x3af   :  { %291 = vperm.xlu1 %1567, %v1857_v50  }
 0x3b3   :  { %1568 = vset.pattern.permute.xlu1 %v1747_v42 }
 0x3b4   :  { %309 = vperm.xlu1 %1568, %v1857_v50  }
 0x3b8   :  { %1569 = vset.pattern.permute.xlu1 %v1744_v37 }
 0x3b9   :  { %329 = vperm.xlu1 %1569, %v1857_v50  }
 0x3bd   :  { %1570 = vset.pattern.permute.xlu1 %v1749_v44 }
 0x3be   :  { %349 = vperm.xlu1 %1570, %v1857_v50  }
 0x3c2   :  { %1571 = vset.pattern.permute.xlu1 %v1750_v45 }
 0x3c3   :  { %369 = vperm.xlu1 %1571, %v1857_v50  }
 0x3c7   :  { %1572 = vset.pattern.permute.xlu1 %v1751_v47 }
 0x3c8   :  { %389 = vperm.xlu1 %1572, %v1857_v50  }
 0x3cc   :  { %1573 = vset.pattern.permute.xlu1 %v1748_v43 }
 0x3cd   :  { %409 = vperm.xlu1 %1573, %v1857_v50  }
 0x3d1   :  { %1574 = vset.pattern.permute.xlu1 %v1752_v48 }
 0x3d2   :  { %429 = vperm.xlu1 %1574, %v1857_v50  }
 0x3d6   :  { %558 = vrot.lane.b32.xlu1 %v1816_v16, %s1746_s2 }
 0x3d7   :  { %1575 = vset.pattern.permute.xlu1 %v1745_v38 }
 0x40b   :  { %v326_v52 = vpop.permute.xlu0 %325  ;;  %v287_v53 = vpop.permute.xlu1 %286 }
 0x40c   :  { %v302_v1 = vmul.f32 %v1893_v62, %v287_v53  ;;  %v340_v7 = vmul.f32 %v1899_v4, %v326_v52  ;;  %v1939_v53 = vrot.slane %v1816_v16, %v334_v61  ;;  %v1952_v61 = vrot.slane %v1816_v16, %v394_v9 }
 0x40f   :  { %v1881_v55 = vpop.permute.xlu0 %479 }
 0x410   :  { %1513 = vmatpush3.xpose.msk.msra.mxu1 %vm60_vm1, %v1881_v55  ;;  %v306_v56 = vpop.permute.xlu1 %305 }
 0x411   :  { %1522 = vmatprep.subr.mxu1 %v1741_v0  ;;  %v320_v63 = vmul.f32 %v1889_v60, %v306_v56 }
 0x413   :  { %v322_v5 = vadd.f32 %v320_v63, %v302_v1 }
 0x415   :  { %v346_v59 = vpop.permute.xlu1 %345  ;;  %v342_v11 = vadd.f32 %v340_v7, %v322_v5 }
 0x416   :  { %v360_v13 = vmul.f32 %v1904_v8, %v346_v59  ;;  %v1944_v59 = vrot.slane %v1816_v16, %v354_v2  ;;  %v1956_v2 = vrot.slane %v1816_v16, %v414_v15  ;;  %v445_v15 = vmul.f32 %v1816_v16, %v1816_v16 }
 0x418   :  { %v362_v19 = vadd.f32 %v360_v13, %v342_v11 }
 0x41a   :  { %v366_v3 = vpop.permute.xlu1 %365 }
 0x41b   :  { %v380_v17 = vmul.f32 %v1909_v14, %v366_v3  ;;  %v1948_v3 = vrot.slane %v1816_v16, %v374_v6  ;;  %v1960_v6 = vrot.slane %v1816_v16, %v434_v23 }
 0x41d   :  { %v382_v24 = vadd.f32 %v380_v17, %v362_v19 }
 0x41f   :  { %v386_v10 = vpop.permute.xlu1 %385 }
 0x420   :  { %v400_v20 = vmul.f32 %v1914_v18, %v386_v10 }
 0x422   :  { %v402_v26 = vadd.f32 %v400_v20, %v382_v24 }
 0x424   :  { %v406_v22 = vpop.permute.xlu1 %405 }
 0x425   :  { %v420_v25 = vmul.f32 %v1918_v21, %v406_v22 }
 0x427   :  { %v422_v29 = vadd.f32 %v420_v25, %v402_v26 }
 0x429   :  { %v426_v28 = vpop.permute.xlu1 %425 }
 0x42a   :  { %v440_v30 = vmul.f32 %v1923_v27, %v426_v28 }
 0x42c   :  { %v442_v31 = vadd.f32 %v440_v30, %v422_v29 }
 0x42e   :  { %477 = vrot.lane.b32.xlu0 %v442_v31, %s1746_s2  ;;  %v292_v32 = vpop.permute.xlu1 %291  ;;  %v460_v35 = vmul.f32 %v442_v31, %v442_v31 }
 0x42f   :  { %v303_v12 = vmul.f32 %v1935_v49, %v292_v32 }
 0x432   :  { %448 = vrot.lane.b32.xlu0 %v444_v33, %s1746_s2 }
 0x433   :  { %v310_v34 = vpop.permute.xlu1 %309 }
 0x434   :  { %v321_v52 = vmul.f32 %v1932_v40, %v310_v34 }
 0x436   :  { %464 = vrot.lane.b32.xlu0 %v460_v35, %s1746_s2  ;;  %v323_v1 = vadd.f32 %v321_v52, %v303_v12 }
 0x438   :  { %v330_v36 = vpop.permute.xlu1 %329 }
 0x439   :  { %v341_v56 = vmul.f32 %v1939_v53, %v330_v36  ;;  %v637_v36 = vand.u32 127, %v294_v51 }
 0x43b   :  { %v343_v58 = vadd.f32 %v341_v56, %v323_v1 }
 0x43d   :  { %v350_v39 = vpop.permute.xlu1 %349 }
 0x43e   :  { %v361_v57 = vmul.f32 %v1944_v59, %v350_v39 }
 0x440   :  { %v363_v7 = vadd.f32 %v361_v57, %v343_v58 }
 0x442   :  { %v370_v46 = vpop.permute.xlu1 %369 }
 0x443   :  { %v381_v5 = vmul.f32 %v1948_v3, %v370_v46  ;;  %v640_v46 = vsub.s32 %v637_v36, %v1879_v54 }
 0x445   :  { %v383_v13 = vadd.f32 %v381_v5, %v363_v7 }
 0x447   :  { %v390_v63 = vpop.permute.xlu1 %389 }
 0x448   :  { %v401_v10 = vmul.f32 %v1952_v61, %v390_v63 }
 0x44a   :  { %v403_v19 = vadd.f32 %v401_v10, %v383_v13 }
 0x44c   :  { %v410_v11 = vpop.permute.xlu1 %409 }
 0x44d   :  { %v421_v17 = vmul.f32 %v1956_v2, %v410_v11 }
 0x44f   :  { %v423_v22 = vadd.f32 %v421_v17, %v403_v19 }
 0x451   :  { %v430_v20 = vpop.permute.xlu1 %429 }
 0x452   :  { %v441_v24 = vmul.f32 %v1960_v6, %v430_v20 }
 0x454   :  { %v443_v9 = vadd.f32 %v441_v24, %v423_v22 }
 0x455   :  { %v1963_v25 = vpop.permute.xlu1 %558 }
 0x456   :  { %1518 = vmatpush3.xpose.msk.msra.mxu0 %vm60_vm1, %v1963_v25  ;;  %556 = vrot.lane.b32.xlu1 %v443_v9, %s1746_s2  ;;  %v461_v23 = vmul.f32 %v443_v9, %v443_v9 }
 0x457   :  { %1527 = vmatprep.subr.mxu0 %v1741_v0 }
 0x45a   :  { %450 = vrot.lane.b32.xlu1 %v445_v15, %s1746_s2 }
 0x45e   :  { %466 = vrot.lane.b32.xlu1 %v461_v23, %s1746_s2 }
 0x4a0   :  { %v478_v26 = vpop.permute.xlu0 %477 }
 0x4a1   :  { %1515 = vmatmul.mubr.msk.f32.vlgmr.msra.gmra.mrb[4].mxu1 %vm60_vm1, %v478_v26 }
 0x4a2   :  { %1523 = vmatpush3.xpose.msk.msra.mxu1 %vm60_vm1, %v1881_v55  ;;  %1524 = vmatprep.mubr.msk.f32.mxu1 %vm1742_vm0, %v1741_v0 }
 0x4a3   :  { %1532 = vmatprep.subr.mxu1 %v1741_v0 }
 0x4a4   :  { %v449_v28 = vpop.permute.xlu0 %448 }
 0x4a5   :  { %v454_v29 = vsel %vm60_vm1, %v449_v28, 0.0 }
 0x4a6   :  { %455 = vadd.xlane.f32.xlu0 %v454_v29 }
 0x4a8   :  { %v465_v16 = vpop.permute.xlu0 %464 }
 0x4a9   :  { %v470_v30 = vsel %vm60_vm1, %v465_v16, 0.0 }
 0x4aa   :  { %471 = vadd.xlane.f32.xlu0 %v470_v30 }
 0x4c8   :  { %v557_v31 = vpop.permute.xlu1 %556 }
 0x4c9   :  { %1520 = vmatmul.mubr.msk.f32.vlgmr.msra.gmra.mrb[4].mxu0 %vm60_vm1, %v557_v31 }
 0x4ca   :  { %1528 = vmatpush3.xpose.msk.msra.mxu0 %vm60_vm1, %v1963_v25  ;;  %1529 = vmatprep.mubr.msk.f32.mxu0 %vm1742_vm0, %v1741_v0 }
 0x4cb   :  { %1537 = vmatprep.subr.mxu0 %v1741_v0 }
 0x4cc   :  { %v451_v32 = vpop.permute.xlu1 %450 }
 0x4cd   :  { %v457_v33 = vsel %vm60_vm1, %v451_v32, 0.0 }
 0x4ce   :  { %458 = vadd.xlane.f32.xlu1 %v457_v33 }
 0x4d0   :  { %v467_v34 = vpop.permute.xlu1 %466 }
 0x4d1   :  { %v473_v35 = vsel %vm60_vm1, %v467_v34, 0.0 }
 0x4d2   :  { %474 = vadd.xlane.f32.xlu0 %v473_v35 }
 0x533   :  { %v456_v39 = vpop.xlane.xlu0 %455 }
 0x534   :  { %v1991_v12 = vrot.slane %v456_v39, %v640_v46 }
 0x537   :  { %v472_v52 = vpop.xlane.xlu0 %471 }
 0x538   :  { %v666_v63 = vadd.f32 %v1991_v12, %v472_v52 }
 0x55b   :  { %v459_v20 = vpop.xlane.xlu1 %458 }
 0x55c   :  { %v1995_v9 = vrot.slane %v459_v20, %v640_v46 }
 0x55f   :  { %v475_v24 = vpop.xlane.xlu0 %474 }
 0x560   :  { %v667_v26 = vadd.f32 %v1995_v9, %v475_v24 }
 0x574   :  { %v551_v56 = vpop.f32.mrb[4].mxu1 }
 0x575   :  { %v668_v1 = vmul.f32 2.0, %v551_v56  ;;  %v1516_v57 = vpop.f32.mrb[5].mxu1 }
 0x577   :  { %v670_v58 = vsub.f32 %v666_v63, %v668_v1 }
 0x579   :  { %v672_v5 = vmax.f32 %v670_v58, 0.0 }
 0x57b   :  { %1629 = vrsqrt.f32 %v672_v5  ;;  %vm676_vm3 = vcmp.eq.f32.partialorder %v672_v5, inf  ;;  %v679_v11 = vand.u32 2147483648, %v672_v5  ;;  %vm678_vm4 = vcmp.eq.f32.partialorder %v672_v5, 0.0 }
 0x585   :  { %v1630_v7 = vpop.eup %1629 }
 0x586   :  { %v675_v10 = vmul.f32 %v1630_v7, %v672_v5 }
 0x588   :  { %v677_v13 = vsel %vm676_vm3, %v672_v5, %v675_v10 }
 0x589   :  { %v680_v51 = vsel %vm678_vm4, %v679_v11, %v677_v13 }
 0x58a   :  { %v688_v17 = vadd.f32 0.01, %v680_v51 }
 0x58c   :  { %1631 = vrcp.f32 %v688_v17 }
 0x596   :  { %v1632_v54 = vpop.eup %1631 }
 0x597   :  { %v692_v19 = vmul.f32 %v1632_v54, %v1838_v41 }
 0x599   :  { %v694_v22 = vand.u32 2147483647, %v692_v19 }
 0x59b   :  { %v696_v15 = vsel %vm261_vm2, %v694_v22, 0.0 }
 0x59c   :  { %697 = vadd.xlane.f32.xlu1 %v696_v15  ;;  %v630_v23 = vpop.f32.mrb[4].mxu0 }
 0x59d   :  { %v669_v28 = vmul.f32 2.0, %v630_v23  ;;  %v1521_v29 = vpop.f32.mrb[5].mxu0 }
 0x59f   :  { %v671_v16 = vsub.f32 %v667_v26, %v669_v28 }
 0x5a1   :  { %v673_v30 = vmax.f32 %v671_v16, 0.0 }
 0x5a3   :  { %1633 = vrsqrt.f32 %v673_v30  ;;  %vm683_vm5 = vcmp.eq.f32.partialorder %v673_v30, inf  ;;  %v686_v33 = vand.u32 2147483648, %v673_v30  ;;  %vm685_vm6 = vcmp.eq.f32.partialorder %v673_v30, 0.0 }
 0x5ad   :  { %v1634_v31 = vpop.eup %1633 }
 0x5ae   :  { %v682_v32 = vmul.f32 %v1634_v31, %v673_v30 }
 0x5b0   :  { %v684_v34 = vsel %vm683_vm5, %v673_v30, %v682_v32 }
 0x5b1   :  { %v687_v35 = vsel %vm685_vm6, %v686_v33, %v684_v34 }
 0x5b2   :  { %v689_v36 = vadd.f32 0.01, %v687_v35 }
 0x5b4   :  { %1635 = vrcp.f32 %v689_v36 }
 0x5be   :  { %v1636_v39 = vpop.eup %1635 }
 0x5bf   :  { %v693_v46 = vmul.f32 %v1636_v39, %v1857_v50 }
 0x5c1   :  { %v695_v52 = vand.u32 2147483647, %v693_v46 }
 0x5c3   :  { %v699_v56 = vsel %vm261_vm2, %v695_v52, 0.0 }
 0x5c4   :  { %700 = vadd.xlane.f32.xlu0 %v699_v56 }
 0x629   :  { %v698_v63 = vpop.xlane.xlu1 %697 }
 0x62a   :  { %v702_v1 = vmax.f32 %v698_v63, 1e-12 }
 0x62c   :  { %1637 = vrcp.f32 %v702_v1 }
 0x636   :  { %v1638_v57 = vpop.eup %1637 }
 0x637   :  { %v705_v58 = vmul.f32 %v1638_v57, %v692_v19 }
 0x639   :  { %710 = vperm.xlu1 %1575, %v705_v58   ;;  %781 = vperm.xlu0 %1581, %v705_v58  }
 0x63d   :  { %1576 = vset.pattern.permute.xlu1 %v1747_v42  ;;  %1582 = vset.pattern.permute.xlu0 %v1745_v38 }
 0x63e   :  { %721 = vperm.xlu1 %1576, %v705_v58  }
 0x642   :  { %1577 = vset.pattern.permute.xlu1 %v1744_v37 }
 0x643   :  { %733 = vperm.xlu1 %1577, %v705_v58  }
 0x647   :  { %1578 = vset.pattern.permute.xlu1 %v1749_v44 }
 0x648   :  { %745 = vperm.xlu1 %1578, %v705_v58  }
 0x64c   :  { %1579 = vset.pattern.permute.xlu1 %v1750_v45 }
 0x64d   :  { %757 = vperm.xlu1 %1579, %v705_v58  }
 0x651   :  { %1580 = vset.pattern.permute.xlu1 %v1751_v47  ;;  %v701_v5 = vpop.xlane.xlu0 %700 }
 0x652   :  { %v703_v7 = vmax.f32 %v701_v5, 1e-12  ;;  %769 = vperm.xlu1 %1580, %v705_v58  }
 0x654   :  { %1639 = vrcp.f32 %v703_v7 }
 0x656   :  { %1583 = vset.pattern.permute.xlu1 %v1747_v42 }
 0x65e   :  { %v1640_v10 = vpop.eup %1639 }
 0x65f   :  { %v707_v11 = vmul.f32 %v1640_v10, %v693_v46 }
 0x661   :  { %725 = vperm.xlu1 %1583, %v707_v11   ;;  %715 = vperm.xlu0 %1582, %v707_v11  }
 0x665   :  { %1584 = vset.pattern.permute.xlu1 %v1744_v37  ;;  %1586 = vset.pattern.permute.xlu0 %v1750_v45 }
 0x666   :  { %737 = vperm.xlu1 %1584, %v707_v11   ;;  %761 = vperm.xlu0 %1586, %v707_v11  }
 0x66a   :  { %1585 = vset.pattern.permute.xlu1 %v1749_v44  ;;  %1590 = vset.pattern.permute.xlu0 %v1752_v48 }
 0x66b   :  { %749 = vperm.xlu1 %1585, %v707_v11   ;;  %797 = vperm.xlu0 %1590, %v707_v11  }
 0x66f   :  { %1587 = vset.pattern.permute.xlu1 %v1751_v47  ;;  %1596 = vset.pattern.permute.xlu0 %v1745_v38 }
 0x670   :  { %773 = vperm.xlu1 %1587, %v707_v11  }
 0x674   :  { %1588 = vset.pattern.permute.xlu1 %v1748_v43 }
 0x675   :  { %785 = vperm.xlu1 %1588, %v707_v11  }
 0x679   :  { %1589 = vset.pattern.permute.xlu1 %v1752_v48 }
 0x67a   :  { %793 = vperm.xlu1 %1589, %v705_v58  }
 0x67e   :  { %1591 = vset.pattern.permute.xlu1 %v1745_v38 }
 0x6b8   :  { %v711_v13 = vpop.permute.xlu1 %710  ;;  %v782_v24 = vpop.permute.xlu0 %781 }
 0x6b9   :  { %v718_v30 = vmul.f32 %v711_v13, %v1893_v62 }
 0x6bd   :  { %v722_v51 = vpop.permute.xlu1 %721 }
 0x6be   :  { %v728_v26 = vmul.f32 %v722_v51, %v1889_v60 }
 0x6c0   :  { %v730_v33 = vadd.f32 %v728_v26, %v718_v30 }
 0x6c2   :  { %v734_v17 = vpop.permute.xlu1 %733 }
 0x6c3   :  { %v740_v31 = vmul.f32 %v734_v17, %v1899_v4  ;;  %v788_v17 = vmul.f32 %v782_v24, %v1918_v21 }
 0x6c5   :  { %v742_v46 = vadd.f32 %v740_v31, %v730_v33 }
 0x6c7   :  { %v746_v54 = vpop.permute.xlu1 %745 }
 0x6c8   :  { %v752_v34 = vmul.f32 %v746_v54, %v1904_v8 }
 0x6ca   :  { %v754_v1 = vadd.f32 %v752_v34, %v742_v46 }
 0x6cc   :  { %v758_v19 = vpop.permute.xlu1 %757 }
 0x6cd   :  { %v764_v52 = vmul.f32 %v758_v19, %v1909_v14 }
 0x6cf   :  { %v766_v5 = vadd.f32 %v764_v52, %v754_v1 }
 0x6d1   :  { %v770_v20 = vpop.permute.xlu1 %769 }
 0x6d2   :  { %v776_v57 = vmul.f32 %v770_v20, %v1914_v18 }
 0x6d4   :  { %v778_v11 = vadd.f32 %v776_v57, %v766_v5 }
 0x6e0   :  { %v726_v22 = vpop.permute.xlu1 %725  ;;  %v716_v23 = vpop.permute.xlu0 %715 }
 0x6e1   :  { %v729_v28 = vmul.f32 %v726_v22, %v1932_v40  ;;  %v719_v29 = vmul.f32 %v716_v23, %v1935_v49 }
 0x6e3   :  { %v731_v35 = vadd.f32 %v729_v28, %v719_v29 }
 0x6e5   :  { %v738_v15 = vpop.permute.xlu1 %737  ;;  %v762_v63 = vpop.permute.xlu0 %761 }
 0x6e6   :  { %v741_v32 = vmul.f32 %v738_v15, %v1939_v53  ;;  %v765_v7 = vmul.f32 %v762_v63, %v1948_v3  ;;  %v790_v15 = vadd.f32 %v788_v17, %v778_v11 }
 0x6e8   :  { %v743_v56 = vadd.f32 %v741_v32, %v731_v35 }
 0x6ea   :  { %v750_v16 = vpop.permute.xlu1 %749  ;;  %v798_v26 = vpop.permute.xlu0 %797 }
 0x6eb   :  { %v753_v36 = vmul.f32 %v750_v16, %v1944_v59  ;;  %v801_v29 = vmul.f32 %v798_v26, %v1960_v6 }
 0x6ed   :  { %v755_v58 = vadd.f32 %v753_v36, %v743_v56 }
 0x6ef   :  { %v774_v39 = vpop.permute.xlu1 %773  ;;  %v767_v13 = vadd.f32 %v765_v7, %v755_v58 }
 0x6f0   :  { %v777_v51 = vmul.f32 %v774_v39, %v1952_v61 }
 0x6f2   :  { %v779_v19 = vadd.f32 %v777_v51, %v767_v13 }
 0x6f4   :  { %v786_v10 = vpop.permute.xlu1 %785 }
 0x6f5   :  { %v789_v54 = vmul.f32 %v786_v10, %v1956_v2 }
 0x6f7   :  { %v791_v20 = vadd.f32 %v789_v54, %v779_v19 }
 0x6f9   :  { %v794_v22 = vpop.permute.xlu1 %793  ;;  %v803_v30 = vadd.f32 %v801_v29, %v791_v20 }
 0x6fa   :  { %v800_v23 = vmul.f32 %v794_v22, %v1923_v27 }
 0x6fb   :  { %v805_v24 = vmul.f32 %v803_v30, %v803_v30 }
 0x6fc   :  { %v802_v28 = vadd.f32 %v800_v23, %v790_v15 }
 0x6fe   :  { %821 = vrot.lane.b32.xlu1 %v802_v28, %s1746_s2  ;;  %v804_v16 = vmul.f32 %v802_v28, %v802_v28 }
 0x700   :  { %808 = vrot.lane.b32.xlu0 %v804_v16, %s1746_s2 }
 0x702   :  { %896 = vrot.lane.b32.xlu1 %v803_v30, %s1746_s2 }
 0x706   :  { %810 = vrot.lane.b32.xlu1 %v805_v24, %s1746_s2 }
 0x770   :  { %v822_v31 = vpop.permute.xlu1 %821 }
 0x771   :  { %1525 = vmatmul.mubr.msk.f32.vlgmr.msra.gmra.mrb[6].mxu1 %vm60_vm1, %v822_v31 }
 0x772   :  { %1533 = vmatpush3.xpose.msk.msra.mxu1 %vm60_vm1, %v1881_v55  ;;  %v809_v32 = vpop.permute.xlu0 %808  ;;  %1534 = vmatprep.mubr.msk.f32.mxu1 %vm1742_vm0, %v1741_v0 }
 0x773   :  { %v814_v33 = vsel %vm60_vm1, %v809_v32, 0.0 }
 0x774   :  { %v897_v34 = vpop.permute.xlu1 %896  ;;  %815 = vadd.xlane.f32.xlu0 %v814_v33 }
 0x775   :  { %1530 = vmatmul.mubr.msk.f32.vlgmr.msra.gmra.mrb[6].mxu0 %vm60_vm1, %v897_v34 }
 0x776   :  { %1538 = vmatpush3.xpose.msk.msra.mxu0 %vm60_vm1, %v1963_v25  ;;  %1539 = vmatprep.mubr.msk.f32.mxu0 %vm1742_vm0, %v1741_v0  ;;  %vm1439_vm0 = vcmask 516096  }
 0x778   :  { %v811_v35 = vpop.permute.xlu1 %810 }
 0x779   :  { %v817_v36 = vsel %vm60_vm1, %v811_v35, 0.0 }
 0x77a   :  { %818 = vadd.xlane.f32.xlu1 %v817_v36 }
 0x801   :  { %v816_v55 = vpop.xlane.xlu0 %815 }
 0x802   :  { %v970_v46 = vadd.f32 %v816_v55, %v1991_v12 }
 0x807   :  { %v819_v63 = vpop.xlane.xlu1 %818 }
 0x808   :  { %v971_v58 = vadd.f32 %v819_v63, %v1995_v9 }
 0x844   :  { %v891_v39 = vpop.f32.mrb[6].mxu1 }
 0x845   :  { %v972_v52 = vmul.f32 2.0, %v891_v39  ;;  %v1526_v56 = vpop.f32.mrb[7].mxu1 }
 0x847   :  { %v974_v1 = vsub.f32 %v970_v46, %v972_v52 }
 0x848   :  { %v966_v57 = vpop.f32.mrb[6].mxu0 }
 0x849   :  { %v976_v5 = vmax.f32 %v974_v1, 0.0  ;;  %v973_v25 = vmul.f32 2.0, %v966_v57  ;;  %v1531_v7 = vpop.f32.mrb[7].mxu0 }
 0x84b   :  { %1641 = vrsqrt.f32 %v976_v5  ;;  %v975_v0 = vsub.f32 %v971_v58, %v973_v25  ;;  %vm980_vm7 = vcmp.eq.f32.partialorder %v976_v5, inf  ;;  %v983_v51 = vand.u32 2147483648, %v976_v5 }
 0x84c   :  { %vm982_vm8 = vcmp.eq.f32.partialorder %v976_v5, 0.0 }
 0x84d   :  { %v977_v10 = vmax.f32 %v975_v0, 0.0 }
 0x84f   :  { %1643 = vrsqrt.f32 %v977_v10  ;;  %vm987_vm9 = vcmp.eq.f32.partialorder %v977_v10, inf  ;;  %v990_v23 = vand.u32 2147483648, %v977_v10  ;;  %vm989_vm10 = vcmp.eq.f32.partialorder %v977_v10, 0.0 }
 0x855   :  { %v1642_v11 = vpop.eup %1641 }
 0x856   :  { %v979_v13 = vmul.f32 %v1642_v11, %v976_v5 }
 0x858   :  { %v981_v17 = vsel %vm980_vm7, %v976_v5, %v979_v13 }
 0x859   :  { %v1644_v54 = vpop.eup %1643  ;;  %v984_v22 = vsel %vm982_vm8, %v983_v51, %v981_v17 }
 0x85a   :  { %v986_v19 = vmul.f32 %v1644_v54, %v977_v10  ;;  %v992_v15 = vadd.f32 0.01, %v984_v22 }
 0x85c   :  { %1645 = vrcp.f32 %v992_v15  ;;  %v988_v26 = vsel %vm987_vm9, %v977_v10, %v986_v19 }
 0x85d   :  { %v991_v20 = vsel %vm989_vm10, %v990_v23, %v988_v26 }
 0x85e   :  { %v993_v28 = vadd.f32 0.01, %v991_v20 }
 0x860   :  { %1647 = vrcp.f32 %v993_v28 }
 0x866   :  { %v1646_v29 = vpop.eup %1645 }
 0x867   :  { %v996_v16 = vmul.f32 %v1646_v29, %v1838_v41 }
 0x869   :  { %v998_v30 = vand.u32 2147483647, %v996_v16 }
 0x86a   :  { %v1648_v24 = vpop.eup %1647 }
 0x86b   :  { %v1000_v31 = vsel %vm261_vm2, %v998_v30, 0.0  ;;  %v997_v32 = vmul.f32 %v1648_v24, %v1857_v50 }
 0x86c   :  { %1001 = vadd.xlane.f32.xlu0 %v1000_v31 }
 0x86d   :  { %v999_v33 = vand.u32 2147483647, %v997_v32 }
 0x86f   :  { %v1003_v34 = vsel %vm261_vm2, %v999_v33, 0.0 }
 0x870   :  { %1004 = vadd.xlane.f32.xlu0 %v1003_v34 }
 0x8f9   :  { %v1002_v35 = vpop.xlane.xlu0 %1001 }
 0x8fa   :  { %v1006_v36 = vmax.f32 %v1002_v35, 1e-12 }
 0x8fc   :  { %1649 = vrcp.f32 %v1006_v36 }
 0x8fd   :  { %v1005_v55 = vpop.xlane.xlu0 %1004 }
 0x8fe   :  { %v1007_v39 = vmax.f32 %v1005_v55, 1e-12 }
 0x900   :  { %1651 = vrcp.f32 %v1007_v39 }
 0x906   :  { %v1650_v46 = vpop.eup %1649 }
 0x907   :  { %v1009_v52 = vmul.f32 %v1650_v46, %v996_v16 }
 0x909   :  { %1014 = vperm.xlu1 %1591, %v1009_v52  }
 0x90a   :  { %v1652_v56 = vpop.eup %1651 }
 0x90b   :  { %v1011_v63 = vmul.f32 %v1652_v56, %v997_v32 }
 0x90d   :  { %1592 = vset.pattern.permute.xlu1 %v1747_v42  ;;  %1019 = vperm.xlu0 %1596, %v1011_v63  }
 0x90e   :  { %1025 = vperm.xlu1 %1592, %v1009_v52  }
 0x911   :  { %1597 = vset.pattern.permute.xlu0 %v1751_v47 }
 0x912   :  { %1593 = vset.pattern.permute.xlu1 %v1744_v37  ;;  %1073 = vperm.xlu0 %1597, %v1009_v52  }
 0x913   :  { %1037 = vperm.xlu1 %1593, %v1009_v52  }
 0x916   :  { %1604 = vset.pattern.permute.xlu0 %v1748_v43 }
 0x917   :  { %1594 = vset.pattern.permute.xlu1 %v1749_v44  ;;  %1089 = vperm.xlu0 %1604, %v1011_v63  }
 0x918   :  { %1049 = vperm.xlu1 %1594, %v1009_v52  }
 0x91c   :  { %1595 = vset.pattern.permute.xlu1 %v1750_v45 }
 0x91d   :  { %1061 = vperm.xlu1 %1595, %v1009_v52  }
 0x921   :  { %1598 = vset.pattern.permute.xlu1 %v1748_v43 }
 0x922   :  { %1085 = vperm.xlu1 %1598, %v1009_v52  }
 0x926   :  { %1599 = vset.pattern.permute.xlu1 %v1747_v42 }
 0x927   :  { %1029 = vperm.xlu1 %1599, %v1011_v63  }
 0x92b   :  { %1600 = vset.pattern.permute.xlu1 %v1744_v37 }
 0x92c   :  { %1041 = vperm.xlu1 %1600, %v1011_v63  }
 0x930   :  { %1601 = vset.pattern.permute.xlu1 %v1749_v44 }
 0x931   :  { %1053 = vperm.xlu1 %1601, %v1011_v63  }
 0x935   :  { %1602 = vset.pattern.permute.xlu1 %v1750_v45 }
 0x936   :  { %1065 = vperm.xlu1 %1602, %v1011_v63  }
 0x93a   :  { %1603 = vset.pattern.permute.xlu1 %v1751_v47 }
 0x93b   :  { %1077 = vperm.xlu1 %1603, %v1011_v63  }
 0x93f   :  { %1605 = vset.pattern.permute.xlu1 %v1752_v48 }
 0x940   :  { %1097 = vperm.xlu1 %1605, %v1009_v52  }
 0x944   :  { %1101 = vperm.xlu1 %1605, %v1011_v63  }
 0x948   :  { %1606 = vset.pattern.permute.xlu1 %v1745_v38 }
 0x988   :  { %v1015_v1 = vpop.permute.xlu1 %1014 }
 0x989   :  { %v1022_v13 = vmul.f32 %v1015_v1, %v1893_v62 }
 0x98c   :  { %v1020_v54 = vpop.permute.xlu0 %1019 }
 0x98d   :  { %v1026_v57 = vpop.permute.xlu1 %1025  ;;  %v1023_v28 = vmul.f32 %v1020_v54, %v1935_v49 }
 0x98e   :  { %v1032_v11 = vmul.f32 %v1026_v57, %v1889_v60 }
 0x990   :  { %v1034_v22 = vadd.f32 %v1032_v11, %v1022_v13 }
 0x991   :  { %v1074_v30 = vpop.permute.xlu0 %1073 }
 0x992   :  { %v1038_v58 = vpop.permute.xlu1 %1037  ;;  %v1080_v33 = vmul.f32 %v1074_v30, %v1914_v18 }
 0x993   :  { %v1044_v51 = vmul.f32 %v1038_v58, %v1899_v4 }
 0x995   :  { %v1046_v15 = vadd.f32 %v1044_v51, %v1034_v22 }
 0x996   :  { %v1090_v63 = vpop.permute.xlu0 %1089 }
 0x997   :  { %v1050_v5 = vpop.permute.xlu1 %1049 }
 0x998   :  { %v1056_v19 = vmul.f32 %v1050_v5, %v1904_v8 }
 0x99a   :  { %v1058_v29 = vadd.f32 %v1056_v19, %v1046_v15 }
 0x99c   :  { %v1062_v25 = vpop.permute.xlu1 %1061 }
 0x99d   :  { %v1068_v23 = vmul.f32 %v1062_v25, %v1909_v14  ;;  %v1093_v25 = vmul.f32 %v1090_v63, %v1956_v2 }
 0x99f   :  { %v1070_v24 = vadd.f32 %v1068_v23, %v1058_v29 }
 0x9a1   :  { %v1086_v7 = vpop.permute.xlu1 %1085  ;;  %v1082_v55 = vadd.f32 %v1080_v33, %v1070_v24 }
 0x9a2   :  { %v1092_v39 = vmul.f32 %v1086_v7, %v1918_v21 }
 0x9a4   :  { %v1094_v57 = vadd.f32 %v1092_v39, %v1082_v55 }
 0x9a6   :  { %v1030_v0 = vpop.permute.xlu1 %1029 }
 0x9a7   :  { %v1033_v26 = vmul.f32 %v1030_v0, %v1932_v40 }
 0x9a9   :  { %v1035_v31 = vadd.f32 %v1033_v26, %v1023_v28 }
 0x9ab   :  { %v1042_v10 = vpop.permute.xlu1 %1041 }
 0x9ac   :  { %v1045_v16 = vmul.f32 %v1042_v10, %v1939_v53 }
 0x9ae   :  { %v1047_v34 = vadd.f32 %v1045_v16, %v1035_v31 }
 0x9b0   :  { %v1054_v17 = vpop.permute.xlu1 %1053 }
 0x9b1   :  { %v1057_v32 = vmul.f32 %v1054_v17, %v1944_v59 }
 0x9b3   :  { %v1059_v46 = vadd.f32 %v1057_v32, %v1047_v34 }
 0x9b5   :  { %v1066_v20 = vpop.permute.xlu1 %1065 }
 0x9b6   :  { %v1069_v35 = vmul.f32 %v1066_v20, %v1948_v3 }
 0x9b8   :  { %v1071_v56 = vadd.f32 %v1069_v35, %v1059_v46 }
 0x9ba   :  { %v1078_v36 = vpop.permute.xlu1 %1077 }
 0x9bb   :  { %v1081_v52 = vmul.f32 %v1078_v36, %v1952_v61 }
 0x9bd   :  { %v1083_v58 = vadd.f32 %v1081_v52, %v1071_v56 }
 0x9bf   :  { %v1098_v1 = vpop.permute.xlu1 %1097  ;;  %v1095_v11 = vadd.f32 %v1093_v25, %v1083_v58 }
 0x9c0   :  { %v1104_v5 = vmul.f32 %v1098_v1, %v1923_v27 }
 0x9c2   :  { %v1106_v0 = vadd.f32 %v1104_v5, %v1094_v57 }
 0x9c3   :  { %v1102_v10 = vpop.permute.xlu1 %1101 }
 0x9c4   :  { %v1105_v13 = vmul.f32 %v1102_v10, %v1960_v6  ;;  %1125 = vrot.lane.b32.xlu0 %v1106_v0, %s1746_s2  ;;  %v1108_v51 = vmul.f32 %v1106_v0, %v1106_v0 }
 0x9c6   :  { %v1107_v7 = vadd.f32 %v1105_v13, %v1095_v11 }
 0x9c8   :  { %1112 = vrot.lane.b32.xlu0 %v1108_v51, %s1746_s2  ;;  %1200 = vrot.lane.b32.xlu1 %v1107_v7, %s1746_s2  ;;  %v1109_v17 = vmul.f32 %v1107_v7, %v1107_v7 }
 0x9cc   :  { %1114 = vrot.lane.b32.xlu1 %v1109_v17, %s1746_s2 }
 0xa36   :  { %v1126_v54 = vpop.permute.xlu0 %1125 }
 0xa37   :  { %1535 = vmatmul.mubr.msk.f32.vlgmr.msra.gmra.mrb[8].mxu1 %vm60_vm1, %v1126_v54 }
 0xa3a   :  { %v1201_v22 = vpop.permute.xlu1 %1200  ;;  %v1113_v19 = vpop.permute.xlu0 %1112 }
 0xa3b   :  { %1540 = vmatmul.mubr.msk.f32.vlgmr.msra.gmra.mrb[8].mxu0 %vm60_vm1, %v1201_v22  ;;  %v1118_v15 = vsel %vm60_vm1, %v1113_v19, 0.0 }
 0xa3c   :  { %1119 = vadd.xlane.f32.xlu0 %v1118_v15 }
 0xa3e   :  { %v1115_v23 = vpop.permute.xlu1 %1114 }
 0xa3f   :  { %v1121_v26 = vsel %vm60_vm1, %v1115_v23, 0.0 }
 0xa40   :  { %1122 = vadd.xlane.f32.xlu1 %v1121_v26 }
 0xac9   :  { %v1120_v20 = vpop.xlane.xlu0 %1119 }
 0xaca   :  { %v1274_v29 = vadd.f32 %v1120_v20, %v1991_v12 }
 0xacd   :  { %v1123_v24 = vpop.xlane.xlu1 %1122 }
 0xace   :  { %v1275_v33 = vadd.f32 %v1123_v24, %v1995_v9 }
 0xb0a   :  { %v1195_v28 = vpop.f32.mrb[8].mxu1 }
 0xb0b   :  { %v1276_v16 = vmul.f32 2.0, %v1195_v28  ;;  %v1536_v30 = vpop.f32.mrb[9].mxu1 }
 0xb0d   :  { %v1278_v31 = vsub.f32 %v1274_v29, %v1276_v16 }
 0xb0e   :  { %v1270_v32 = vpop.f32.mrb[8].mxu0 }
 0xb0f   :  { %v1280_v34 = vmax.f32 %v1278_v31, 0.0  ;;  %v1277_v35 = vmul.f32 2.0, %v1270_v32  ;;  %v1541_v36 = vpop.f32.mrb[9].mxu0 }
 0xb11   :  { %1653 = vrsqrt.f32 %v1280_v34  ;;  %v1279_v55 = vsub.f32 %v1275_v33, %v1277_v35  ;;  %vm1284_vm11 = vcmp.eq.f32.partialorder %v1280_v34, inf  ;;  %v1287_v56 = vand.u32 2147483648, %v1280_v34 }
 0xb12   :  { %vm1286_vm12 = vcmp.eq.f32.partialorder %v1280_v34, 0.0 }
 0xb13   :  { %v1281_v39 = vmax.f32 %v1279_v55, 0.0 }
 0xb15   :  { %1655 = vrsqrt.f32 %v1281_v39  ;;  %vm1291_vm13 = vcmp.eq.f32.partialorder %v1281_v39, inf  ;;  %v1294_v5 = vand.u32 2147483648, %v1281_v39  ;;  %vm1293_vm14 = vcmp.eq.f32.partialorder %v1281_v39, 0.0 }
 0xb1b   :  { %v1654_v46 = vpop.eup %1653 }
 0xb1c   :  { %v1283_v52 = vmul.f32 %v1654_v46, %v1280_v34 }
 0xb1e   :  { %v1285_v63 = vsel %vm1284_vm11, %v1280_v34, %v1283_v52 }
 0xb1f   :  { %v1656_v12 = vpop.eup %1655  ;;  %v1288_v1 = vsel %vm1286_vm12, %v1287_v56, %v1285_v63 }
 0xb20   :  { %v1290_v57 = vmul.f32 %v1656_v12, %v1281_v39  ;;  %v1296_v58 = vadd.f32 0.01, %v1288_v1 }
 0xb22   :  { %1657 = vrcp.f32 %v1296_v58  ;;  %v1292_v9 = vsel %vm1291_vm13, %v1281_v39, %v1290_v57 }
 0xb23   :  { %v1295_v25 = vsel %vm1293_vm14, %v1294_v5, %v1292_v9 }
 0xb24   :  { %v1297_v0 = vadd.f32 0.01, %v1295_v25 }
 0xb26   :  { %1659 = vrcp.f32 %v1297_v0 }
 0xb2c   :  { %v1658_v10 = vpop.eup %1657 }
 0xb2d   :  { %v1300_v11 = vmul.f32 %v1658_v10, %v1838_v41 }
 0xb2f   :  { %v1302_v13 = vand.u32 2147483647, %v1300_v11 }
 0xb30   :  { %v1660_v7 = vpop.eup %1659 }
 0xb31   :  { %v1304_v51 = vsel %vm261_vm2, %v1302_v13, 0.0  ;;  %v1301_v17 = vmul.f32 %v1660_v7, %v1857_v50 }
 0xb32   :  { %1305 = vadd.xlane.f32.xlu0 %v1304_v51 }
 0xb33   :  { %v1303_v54 = vand.u32 2147483647, %v1301_v17 }
 0xb35   :  { %v1307_v22 = vsel %vm261_vm2, %v1303_v54, 0.0 }
 0xb36   :  { %1308 = vadd.xlane.f32.xlu0 %v1307_v22 }
 0xbbf   :  { %v1306_v19 = vpop.xlane.xlu0 %1305 }
 0xbc0   :  { %v1310_v15 = vmax.f32 %v1306_v19, 1e-12 }
 0xbc2   :  { %1661 = vrcp.f32 %v1310_v15 }
 0xbc3   :  { %v1309_v23 = vpop.xlane.xlu0 %1308 }
 0xbc4   :  { %v1311_v26 = vmax.f32 %v1309_v23, 1e-12 }
 0xbc6   :  { %1663 = vrcp.f32 %v1311_v26 }
 0xbcc   :  { %v1662_v20 = vpop.eup %1661 }
 0xbcd   :  { %v1313_v28 = vmul.f32 %v1662_v20, %v1300_v11 }
 0xbcf   :  { %1318 = vperm.xlu1 %1606, %v1313_v28   ;;  %1389 = vperm.xlu0 %1604, %v1313_v28  }
 0xbd0   :  { %v1664_v41 = vpop.eup %1663 }
 0xbd1   :  { %v1315_v29 = vmul.f32 %v1664_v41, %v1301_v17 }
 0xbd3   :  { %1607 = vset.pattern.permute.xlu1 %v1747_v42  ;;  %1612 = vset.pattern.permute.xlu0 %v1745_v38 }
 0xbd4   :  { %1329 = vperm.xlu1 %1607, %v1313_v28   ;;  %1323 = vperm.xlu0 %1612, %v1315_v29  }
 0xbd8   :  { %1608 = vset.pattern.permute.xlu1 %v1744_v37  ;;  %1616 = vset.pattern.permute.xlu0 %v1750_v45 }
 0xbd9   :  { %1341 = vperm.xlu1 %1608, %v1313_v28   ;;  %1369 = vperm.xlu0 %1616, %v1315_v29  }
 0xbdd   :  { %1609 = vset.pattern.permute.xlu1 %v1749_v44  ;;  %1620 = vset.pattern.permute.xlu0 %v1752_v48 }
 0xbde   :  { %1353 = vperm.xlu1 %1609, %v1313_v28   ;;  %1405 = vperm.xlu0 %1620, %v1315_v29  }
 0xbe2   :  { %1610 = vset.pattern.permute.xlu1 %v1750_v45 }
 0xbe3   :  { %1365 = vperm.xlu1 %1610, %v1313_v28  }
 0xbe7   :  { %1611 = vset.pattern.permute.xlu1 %v1751_v47 }
 0xbe8   :  { %1377 = vperm.xlu1 %1611, %v1313_v28  }
 0xbec   :  { %1613 = vset.pattern.permute.xlu1 %v1747_v42 }
 0xbed   :  { %1333 = vperm.xlu1 %1613, %v1315_v29  }
 0xbf1   :  { %1614 = vset.pattern.permute.xlu1 %v1744_v37 }
 0xbf2   :  { %1345 = vperm.xlu1 %1614, %v1315_v29  }
 0xbf6   :  { %1615 = vset.pattern.permute.xlu1 %v1749_v44 }
 0xbf7   :  { %1357 = vperm.xlu1 %1615, %v1315_v29  }
 0xbfb   :  { %1617 = vset.pattern.permute.xlu1 %v1751_v47 }
 0xbfc   :  { %1381 = vperm.xlu1 %1617, %v1315_v29  }
 0xc00   :  { %1618 = vset.pattern.permute.xlu1 %v1748_v43 }
 0xc01   :  { %1393 = vperm.xlu1 %1618, %v1315_v29  }
 0xc05   :  { %1619 = vset.pattern.permute.xlu1 %v1752_v48 }
 0xc06   :  { %1401 = vperm.xlu1 %1619, %v1313_v28  }
 0xc4e   :  { %v1319_v38 = vpop.permute.xlu1 %1318  ;;  %v1390_v37 = vpop.permute.xlu0 %1389 }
 0xc4f   :  { %v1326_v55 = vmul.f32 %v1319_v38, %v1893_v62  ;;  %v1396_v0 = vmul.f32 %v1390_v37, %v1918_v21 }
 0xc53   :  { %v1330_v45 = vpop.permute.xlu1 %1329  ;;  %v1324_v31 = vpop.permute.xlu0 %1323 }
 0xc54   :  { %v1327_v47 = vmul.f32 %v1324_v31, %v1935_v49  ;;  %v1336_v48 = vmul.f32 %v1330_v45, %v1889_v60 }
 0xc56   :  { %v1338_v56 = vadd.f32 %v1336_v48, %v1326_v55 }
 0xc58   :  { %v1342_v50 = vpop.permute.xlu1 %1341  ;;  %v1370_v46 = vpop.permute.xlu0 %1369 }
 0xc59   :  { %v1348_v39 = vmul.f32 %v1342_v50, %v1899_v4  ;;  %v1373_v49 = vmul.f32 %v1370_v46, %v1948_v3 }
 0xc5d   :  { %v1354_v42 = vpop.permute.xlu1 %1353  ;;  %v1406_v62 = vpop.permute.xlu0 %1405 }
 0xc62   :  { %v1366_v16 = vpop.permute.xlu1 %1365 }
 0xc63   :  { %v1372_v12 = vmul.f32 %v1366_v16, %v1909_v14 }
 0xc67   :  { %v1378_v30 = vpop.permute.xlu1 %1377 }
 0xc6c   :  { %v1334_v24 = vpop.permute.xlu1 %1333 }
 0xc6d   :  { %v1337_v44 = vmul.f32 %v1334_v24, %v1932_v40  ;;  %v1360_v40 = vmul.f32 %v1354_v42, %v1904_v8  ;;  %v1409_v8 = vmul.f32 %v1406_v62, %v1960_v6 }
 0xc6f   :  { %v1339_v33 = vadd.f32 %v1337_v44, %v1327_v47 }
 0xc71   :  { %v1346_v32 = vpop.permute.xlu1 %1345 }
 0xc72   :  { %v1349_v43 = vmul.f32 %v1346_v32, %v1939_v53  ;;  %v1350_v53 = vadd.f32 %v1348_v39, %v1338_v56 }
 0xc74   :  { %v1351_v35 = vadd.f32 %v1349_v43, %v1339_v33  ;;  %v1362_v57 = vadd.f32 %v1360_v40, %v1350_v53 }
 0xc76   :  { %v1358_v34 = vpop.permute.xlu1 %1357  ;;  %v1374_v58 = vadd.f32 %v1372_v12, %v1362_v57 }
 0xc77   :  { %v1361_v36 = vmul.f32 %v1358_v34, %v1944_v59  ;;  %v1384_v59 = vmul.f32 %v1378_v30, %v1914_v18 }
 0xc79   :  { %v1363_v52 = vadd.f32 %v1361_v36, %v1351_v35  ;;  %v1386_v25 = vadd.f32 %v1384_v59, %v1374_v58 }
 0xc7b   :  { %v1382_v63 = vpop.permute.xlu1 %1381  ;;  %v1375_v60 = vadd.f32 %v1373_v49, %v1363_v52  ;;  %v1398_v11 = vadd.f32 %v1396_v0, %v1386_v25 }
 0xc7c   :  { %v1385_v1 = vmul.f32 %v1382_v63, %v1952_v61 }
 0xc7e   :  { %v1387_v5 = vadd.f32 %v1385_v1, %v1375_v60 }
 0xc80   :  { %v1394_v4 = vpop.permute.xlu1 %1393 }
 0xc81   :  { %v1397_v9 = vmul.f32 %v1394_v4, %v1956_v2 }
 0xc83   :  { %v1399_v3 = vadd.f32 %v1397_v9, %v1387_v5 }
 0xc85   :  { %v1411_v14 = vadd.f32 %v1409_v8, %v1399_v3  ;;  %v1402_v10 = vpop.permute.xlu1 %1401 }
 0xc86   :  { %v1408_v61 = vmul.f32 %v1402_v10, %v1923_v27 }
 0xc87   :  { %v1420_v13 = vsel %vm1412_vm15, %v1411_v14, 0.0 }
 0xc88   :  { %v1410_v18 = vadd.f32 %v1408_v61, %v1398_v11  ;;  %v1421_v7 = vrot.slane %v1420_v13, 4 }
 0xc8a   :  { %v1413_v51 = vsel %vm1412_vm15, %v1410_v18, 0.0  ;;  %v1422_v17 = vadd.f32 %v1421_v7, %v1420_v13 }
 0xc8b   :  { %v1414_v54 = vrot.slane %v1413_v51, 4 }
 0xc8c   :  { %v1423_v22 = vrot.slane %v1422_v17, 2 }
 0xc8d   :  { %v1415_v2 = vadd.f32 %v1414_v54, %v1413_v51 }
 0xc8e   :  { %v1424_v15 = vadd.f32 %v1423_v22, %v1422_v17 }
 0xc8f   :  { %v1416_v19 = vrot.slane %v1415_v2, 2 }
 0xc90   :  { %v1425_v26 = vrot.slane %v1424_v15, 1 }
 0xc91   :  { %v1417_v6 = vadd.f32 %v1416_v19, %v1415_v2 }
 0xc92   :  { %v1426_v28 = vadd.f32 %v1425_v26, %v1424_v15 }
 0xc93   :  { %v1418_v23 = vrot.slane %v1417_v6, 1 }
 0xc94   :  { %v1429_v41 = vmul.f32 0.125, %v1426_v28 }
 0xc95   :  { %v1419_v21 = vadd.f32 %v1418_v23, %v1417_v6 }
 0xc97   :  { %v1428_v20 = vmul.f32 0.125, %v1419_v21 }
 0xc99   :  { %1431 = vrot.lane.b32.xlu1 %v1428_v20, %s1746_s2 }
 0xc9d   :  { %1435 = vrot.lane.b32.xlu1 %v1429_v41, %s1743_s11 }
 0xd0b   :  { %v1432_v27 = vpop.permute.xlu1 %1431 }
 0xd0f   :  { %v1436_v29 = vpop.permute.xlu1 %1435 }
 0xd10   :  { %v1438_v38 = vsel %vm60_vm1, %v1432_v27, %v1436_v29 }
 0xd11   :  { %1440 = vst.msk [vmem:[#allocation7] sm:$0x1] %vm1439_vm0, %v1438_v38 }
 0xd12   :  { %1720 = shalt.err (!%p1717_p6)
}
 0xd13   :  { %s1721_s18 = scalar_lea.hbm %s2147_s3, 16 }
 0xd14   :  { %p1722_p7 = scmp.ne.s32.totalorder %s2147_s3, %s1721_s18  ;;  %p1725_p8 = scmp.lt.u32.totalorder %s1721_s18, %s2147_s3 }
 0xd16   :  { %p1727_p9 = pnand %p1725_p8, %p1722_p7 }
 0xd18   :  { %1730 = shalt.err (!%p1727_p9)
}
 0xd19   :  { %1450 = dma.vmem_to_hbm [thread:$0]  %s1448_s13, 16, %s2147_s3, [#allocation4]  }
 0xd1a   :  { %1735 = dma.done.wait [#allocation4], 16  }
 0xd1b   :  { %1736 = vsyncadd [#allocation4], 4294967280 }
 0xd1c   :  { %1454 = vsyncpa [#allocation3], 1 }
 0xd1d   :  { %1455 = vsyncpa [#allocation6], 1 }
 0xd1e   :  { %1456 = vsyncpa [#allocation4], 1 }

</bundles_post_ra>
